<compile_context>
chip_gen: v7x
topology: tpu7x:2x2x1
jax: 0.10.0
libtpu: 0.0.40
codegen_flags: <defaults>
</compile_context>

<pallas_src>
import math

import jax
import jax.numpy as jnp
from jax import lax
from jax.experimental import pallas as pl
from jax.experimental.pallas import tpu as pltpu

_LOG_SQRT_2PI = 0.5 * math.log(2.0 * math.pi)
_CHUNK = 512  # inner lane-chunk width; keeps peak live vregs well under 64


def spn_neuron_kernel(x_ref, params_ref, lw0_ref, lw1_ref, o_ref):
    # x_ref:      (F, BN)        features on sublanes, batch on lanes
    # params_ref: (F, 8)         cols: m0, 1/s0, b0, m1, 1/s1, b1, pad, pad
    #                            (b* = -log(std) - 0.5*log(2*pi))
    # lw*_ref:    (F, F*_CHUNK)  column-block a holds log w[a*F + b, *] on
    #                            sublane b, replicated across _CHUNK lanes
    # o_ref:      (1, BN)        lane-dense per-sample log-likelihood row
    n_feat = x_ref.shape[0]
    n_chunks = x_ref.shape[1] // _CHUNK

    params = params_ref[...]                              # tiny, loaded once
    m0, is0, b0 = params[:, 0:1], params[:, 1:2], params[:, 2:3]
    m1, is1, b1 = params[:, 3:4], params[:, 4:5], params[:, 5:6]

    def chunk_body(c, carry):
        off = pl.multiple_of(c * _CHUNK, _CHUNK)
        x = x_ref[:, pl.ds(off, _CHUNK)]                  # (F, C)
        z0 = (x - m0) * is0
        z1 = (x - m1) * is1
        lp0 = b0 - 0.5 * z0 * z0                          # leaf log-probs, mix 0
        lp1 = b1 - 0.5 * z1 * z1                          # leaf log-probs, mix 1

        acc = jnp.zeros_like(lp0)                         # (F, C) elementwise acc
        # Static unroll over the first pair element `a` (F is small here; use
        # lax.fori_loop with modest unroll instead if F grows large).
        for a in range(n_feat):
            t0 = lp0[a:a + 1, :] + lp0 + lw0_ref[:, a * _CHUNK:(a + 1) * _CHUNK]
            t1 = lp1[a:a + 1, :] + lp1 + lw1_ref[:, a * _CHUNK:(a + 1) * _CHUNK]
            hi = jnp.maximum(t0, t1)
            lo = jnp.minimum(t0, t1)
            # one-exp logaddexp in min/max form (1 exp + 1 log, no abs/neg)
            acc = acc + hi + jnp.log(1.0 + jnp.exp(lo - hi))
        # single cross-sublane reduction: root log-product over all F*F sum nodes
        o_ref[:, pl.ds(off, _CHUNK)] = jnp.sum(acc, axis=0, keepdims=True)
        return carry

    lax.fori_loop(0, n_chunks, chunk_body, 0)


def spn_neuron_forward(x, means, stdevs, weights, *, block_n=2048):
    """SPNNeuron forward.

    x:       (N, F) float32 inputs (PyTorch layout).
    means:   (F, 3) — only columns 0 and 1 are used, as in the module __init__.
    stdevs:  (F, 3) — only columns 0 and 1 are used.
    weights: (F*F, 2) row-normalized sum-node weights, pair k = a*F + b.
    Returns: (N,) per-sample log-likelihoods.
    """
    n, f = x.shape
    f32 = jnp.float32

    # --- tile sizing: amortize per-grid-step overhead but keep >= 2 grid steps
    # when possible (v7x has 2 TensorCores); block_n must be a _CHUNK multiple.
    block_n = max(_CHUNK, (block_n // _CHUNK) * _CHUNK)
    two_step = max(_CHUNK, pl.cdiv(pl.cdiv(n, 2), _CHUNK) * _CHUNK)
    block_n = min(block_n, two_step)
    grid = (pl.cdiv(n, block_n),)

    # --- parameter precompute (once, outside the kernel) ---
    m0 = means[:, 0].astype(f32)
    m1 = means[:, 1].astype(f32)
    s0 = stdevs[:, 0].astype(f32)
    s1 = stdevs[:, 1].astype(f32)
    zeros = jnp.zeros((f,), f32)
    params = jnp.stack(
        [m0, 1.0 / s0, -jnp.log(s0) - _LOG_SQRT_2PI,
         m1, 1.0 / s1, -jnp.log(s1) - _LOG_SQRT_2PI,
         zeros, zeros],
        axis=1,
    )                                                       # (F, 8)

    # pair k = a*F + b -> (F, F)[a, b]; pre-broadcast column a across _CHUNK
    # lanes so the kernel does a plain full-vreg load per a-iteration.
    lw0 = jnp.log(weights[:, 0].astype(f32)).reshape(f, f)
    lw1 = jnp.log(weights[:, 1].astype(f32)).reshape(f, f)
    lw0b = jnp.broadcast_to(lw0.T[:, :, None], (f, f, _CHUNK)).reshape(f, f * _CHUNK)
    lw1b = jnp.broadcast_to(lw1.T[:, :, None], (f, f, _CHUNK)).reshape(f, f * _CHUNK)

    # --- batch on the lane axis; ragged tail handled by the masked last block
    # (garbage lanes only affect their own output lanes, which are discarded).
    xt = x.astype(f32).T                                    # (F, N)

    out = pl.pallas_call(
        spn_neuron_kernel,
        out_shape=jax.ShapeDtypeStruct((1, n), jnp.float32),
        grid=grid,
        in_specs=[
            pl.BlockSpec((f, block_n), lambda i: (0, i)),      # x^T: batch tiles
            pl.BlockSpec((f, 8), lambda i: (0, 0)),            # packed gaussian params
            pl.BlockSpec((f, f * _CHUNK), lambda i: (0, 0)),   # log w, mixture 0
            pl.BlockSpec((f, f * _CHUNK), lambda i: (0, 0)),   # log w, mixture 1
        ],
        out_specs=pl.BlockSpec((1, block_n), lambda i: (0, i)),  # lane-dense output
        compiler_params=pltpu.CompilerParams(dimension_semantics=("parallel",)),
    )(xt, params, lw0b, lw1b)
    return out[0]


def _gauss_logpdf(x, mean, std):
    z = (x - mean) / std
    return -0.5 * z * z - jnp.log(std) - _LOG_SQRT_2PI


def _reference(x, means, stdevs, weights):
    f = x.shape[1]
    lp0 = _gauss_logpdf(x, means[None, :, 0], stdevs[None, :, 0])
    lp1 = _gauss_logpdf(x, means[None, :, 1], stdevs[None, :, 1])
    lw0 = jnp.log(weights[:, 0]).reshape(f, f)
    lw1 = jnp.log(weights[:, 1]).reshape(f, f)
    p0 = lp0[:, :, None] + lp0[:, None, :] + lw0[None, :, :]
    p1 = lp1[:, :, None] + lp1[:, None, :] + lw1[None, :, :]
    return jnp.sum(jnp.logaddexp(p0, p1), axis=(1, 2))


if __name__ == "__main__":
    N, F = 1000, 8  # batch (not a multiple of block_n -> ragged tail), in_features

    key = jax.random.PRNGKey(0)
    kx, km, ks, kw = jax.random.split(key, 4)

    x = jax.random.normal(kx, (N, F), jnp.float32)

    # Deterministic stand-ins for the module's __init__ randomness:
    # means ~ randn(F, 3), stdevs ~ rand(F, 3) (clamped away from 0 for numerics),
    # sum weights ~ rand(F*F, 2) normalized per row. Only columns 0 and 1 of
    # means/stdevs are used, exactly as in the PyTorch __init__.
    means = jax.random.normal(km, (F, 3), jnp.float32)
    stdevs = jax.random.uniform(ks, (F, 3), jnp.float32, minval=0.1, maxval=1.0)
    w = jax.random.uniform(kw, (F * F, 2), jnp.float32, minval=1e-3, maxval=1.0)
    w = w / jnp.sum(w, axis=1, keepdims=True)

    out = spn_neuron_forward(x, means, stdevs, w, block_n=2048)
    out = jax.block_until_ready(out)

    ref = _reference(x, means, stdevs, w)
    assert out.shape == (N,)
    assert jnp.allclose(out, ref, rtol=1e-5, atol=1e-4), (out, ref)

    print("KERNEL_OK")
</pallas_src>

<mosaic_0001>
module attributes {stable_mosaic.version = 11 : i64} {
  func.func @spn_neuron_kernel(%arg0: i32, %arg1: memref<8x512xf32, #tpu.memory_space<vmem>>, %arg2: memref<8x8xf32, #tpu.memory_space<vmem>>, %arg3: memref<8x4096xf32, #tpu.memory_space<vmem>>, %arg4: memref<8x4096xf32, #tpu.memory_space<vmem>>, %arg5: memref<1x512xf32, #tpu.memory_space<vmem>>) attributes {dimension_semantics = [#tpu.dimension_semantics<parallel>], iteration_bounds = array<i64: 2>, scalar_prefetch = 0 : i64, scratch_operands = 0 : i64, tpu.core_type = #tpu.core_type<tc>, window_params = [{transform_indices = @transform_0, window_bounds = array<i64: 8, 512>}, {pipeline_mode = #tpu.pipeline_mode<synchronous>, transform_indices = @transform_1, window_bounds = array<i64: 8, 8>}, {pipeline_mode = #tpu.pipeline_mode<synchronous>, transform_indices = @transform_2, window_bounds = array<i64: 8, 4096>}, {pipeline_mode = #tpu.pipeline_mode<synchronous>, transform_indices = @transform_3, window_bounds = array<i64: 8, 4096>}, {transform_indices = @transform_4, window_bounds = array<i64: 1, 512>}]} {
    %c0 = arith.constant 0 : index
    %c0_0 = arith.constant 0 : index
    %0 = vector.load %arg2[%c0, %c0_0] : memref<8x8xf32, #tpu.memory_space<vmem>>, vector<8x8xf32>
    %1 = vector.extract_strided_slice %0 {offsets = [0, 0], sizes = [8, 1], strides = [1, 1]} : vector<8x8xf32> to vector<8x1xf32>
    %2 = vector.extract_strided_slice %0 {offsets = [0, 1], sizes = [8, 1], strides = [1, 1]} : vector<8x8xf32> to vector<8x1xf32>
    %3 = vector.extract_strided_slice %0 {offsets = [0, 2], sizes = [8, 1], strides = [1, 1]} : vector<8x8xf32> to vector<8x1xf32>
    %4 = vector.extract_strided_slice %0 {offsets = [0, 3], sizes = [8, 1], strides = [1, 1]} : vector<8x8xf32> to vector<8x1xf32>
    %5 = vector.extract_strided_slice %0 {offsets = [0, 4], sizes = [8, 1], strides = [1, 1]} : vector<8x8xf32> to vector<8x1xf32>
    %6 = vector.extract_strided_slice %0 {offsets = [0, 5], sizes = [8, 1], strides = [1, 1]} : vector<8x8xf32> to vector<8x1xf32>
    %c0_i32 = arith.constant 0 : i32
    %c512_i32 = arith.constant 512 : i32
    %7 = arith.muli %c0_i32, %c512_i32 : i32
    %8 = tpu.assume_multiple %7, 512 : i32
    %c0_1 = arith.constant 0 : index
    %9 = arith.index_cast %8 : i32 to index
    %10 = vector.load %arg1[%c0_1, %9] : memref<8x512xf32, #tpu.memory_space<vmem>>, vector<8x512xf32>
    %11 = vector.broadcast %1 : vector<8x1xf32> to vector<8x512xf32>
    %12 = arith.subf %10, %11 : vector<8x512xf32>
    %13 = vector.broadcast %2 : vector<8x1xf32> to vector<8x512xf32>
    %14 = arith.mulf %12, %13 : vector<8x512xf32>
    %15 = vector.broadcast %4 : vector<8x1xf32> to vector<8x512xf32>
    %16 = arith.subf %10, %15 : vector<8x512xf32>
    %17 = vector.broadcast %5 : vector<8x1xf32> to vector<8x512xf32>
    %18 = arith.mulf %16, %17 : vector<8x512xf32>
    %cst = arith.constant 5.000000e-01 : f32
    %19 = vector.broadcast %cst : f32 to vector<8x512xf32>
    %20 = arith.mulf %19, %14 : vector<8x512xf32>
    %21 = arith.mulf %20, %14 : vector<8x512xf32>
    %22 = vector.broadcast %3 : vector<8x1xf32> to vector<8x512xf32>
    %23 = arith.subf %22, %21 : vector<8x512xf32>
    %cst_2 = arith.constant 5.000000e-01 : f32
    %24 = vector.broadcast %cst_2 : f32 to vector<8x512xf32>
    %25 = arith.mulf %24, %18 : vector<8x512xf32>
    %26 = arith.mulf %25, %18 : vector<8x512xf32>
    %27 = vector.broadcast %6 : vector<8x1xf32> to vector<8x512xf32>
    %28 = arith.subf %27, %26 : vector<8x512xf32>
    %cst_3 = arith.constant 0.000000e+00 : f32
    %29 = vector.broadcast %cst_3 : f32 to vector<8x512xf32>
    %30 = vector.extract_strided_slice %23 {offsets = [0, 0], sizes = [1, 512], strides = [1, 1]} : vector<8x512xf32> to vector<1x512xf32>
    %31 = vector.broadcast %30 : vector<1x512xf32> to vector<8x512xf32>
    %32 = arith.addf %31, %23 : vector<8x512xf32>
    %c0_4 = arith.constant 0 : index
    %c0_5 = arith.constant 0 : index
    %33 = vector.load %arg3[%c0_4, %c0_5] : memref<8x4096xf32, #tpu.memory_space<vmem>>, vector<8x512xf32>
    %34 = arith.addf %32, %33 : vector<8x512xf32>
    %35 = vector.extract_strided_slice %28 {offsets = [0, 0], sizes = [1, 512], strides = [1, 1]} : vector<8x512xf32> to vector<1x512xf32>
    %36 = vector.broadcast %35 : vector<1x512xf32> to vector<8x512xf32>
    %37 = arith.addf %36, %28 : vector<8x512xf32>
    %c0_6 = arith.constant 0 : index
    %c0_7 = arith.constant 0 : index
    %38 = vector.load %arg4[%c0_6, %c0_7] : memref<8x4096xf32, #tpu.memory_space<vmem>>, vector<8x512xf32>
    %39 = arith.addf %37, %38 : vector<8x512xf32>
    %40 = arith.maximumf %34, %39 : vector<8x512xf32>
    %41 = arith.minimumf %34, %39 : vector<8x512xf32>
    %42 = arith.addf %29, %40 : vector<8x512xf32>
    %43 = arith.subf %41, %40 : vector<8x512xf32>
    %44 = math.exp %43 : vector<8x512xf32>
    %cst_8 = arith.constant 1.000000e+00 : f32
    %45 = vector.broadcast %cst_8 : f32 to vector<8x512xf32>
    %46 = arith.addf %45, %44 : vector<8x512xf32>
    %47 = math.log %46 : vector<8x512xf32>
    %48 = arith.addf %42, %47 : vector<8x512xf32>
    %49 = vector.extract_strided_slice %23 {offsets = [1, 0], sizes = [1, 512], strides = [1, 1]} : vector<8x512xf32> to vector<1x512xf32>
    %50 = vector.broadcast %49 : vector<1x512xf32> to vector<8x512xf32>
    %51 = arith.addf %50, %23 : vector<8x512xf32>
    %c0_9 = arith.constant 0 : index
    %c512 = arith.constant 512 : index
    %52 = vector.load %arg3[%c0_9, %c512] : memref<8x4096xf32, #tpu.memory_space<vmem>>, vector<8x512xf32>
    %53 = arith.addf %51, %52 : vector<8x512xf32>
    %54 = vector.extract_strided_slice %28 {offsets = [1, 0], sizes = [1, 512], strides = [1, 1]} : vector<8x512xf32> to vector<1x512xf32>
    %55 = vector.broadcast %54 : vector<1x512xf32> to vector<8x512xf32>
    %56 = arith.addf %55, %28 : vector<8x512xf32>
    %c0_10 = arith.constant 0 : index
    %c512_11 = arith.constant 512 : index
    %57 = vector.load %arg4[%c0_10, %c512_11] : memref<8x4096xf32, #tpu.memory_space<vmem>>, vector<8x512xf32>
    %58 = arith.addf %56, %57 : vector<8x512xf32>
    %59 = arith.maximumf %53, %58 : vector<8x512xf32>
    %60 = arith.minimumf %53, %58 : vector<8x512xf32>
    %61 = arith.addf %48, %59 : vector<8x512xf32>
    %62 = arith.subf %60, %59 : vector<8x512xf32>
    %63 = math.exp %62 : vector<8x512xf32>
    %cst_12 = arith.constant 1.000000e+00 : f32
    %64 = vector.broadcast %cst_12 : f32 to vector<8x512xf32>
    %65 = arith.addf %64, %63 : vector<8x512xf32>
    %66 = math.log %65 : vector<8x512xf32>
    %67 = arith.addf %61, %66 : vector<8x512xf32>
    %68 = vector.extract_strided_slice %23 {offsets = [2, 0], sizes = [1, 512], strides = [1, 1]} : vector<8x512xf32> to vector<1x512xf32>
    %69 = vector.broadcast %68 : vector<1x512xf32> to vector<8x512xf32>
    %70 = arith.addf %69, %23 : vector<8x512xf32>
    %c0_13 = arith.constant 0 : index
    %c1024 = arith.constant 1024 : index
    %71 = vector.load %arg3[%c0_13, %c1024] : memref<8x4096xf32, #tpu.memory_space<vmem>>, vector<8x512xf32>
    %72 = arith.addf %70, %71 : vector<8x512xf32>
    %73 = vector.extract_strided_slice %28 {offsets = [2, 0], sizes = [1, 512], strides = [1, 1]} : vector<8x512xf32> to vector<1x512xf32>
    %74 = vector.broadcast %73 : vector<1x512xf32> to vector<8x512xf32>
    %75 = arith.addf %74, %28 : vector<8x512xf32>
    %c0_14 = arith.constant 0 : index
    %c1024_15 = arith.constant 1024 : index
    %76 = vector.load %arg4[%c0_14, %c1024_15] : memref<8x4096xf32, #tpu.memory_space<vmem>>, vector<8x512xf32>
    %77 = arith.addf %75, %76 : vector<8x512xf32>
    %78 = arith.maximumf %72, %77 : vector<8x512xf32>
    %79 = arith.minimumf %72, %77 : vector<8x512xf32>
    %80 = arith.addf %67, %78 : vector<8x512xf32>
    %81 = arith.subf %79, %78 : vector<8x512xf32>
    %82 = math.exp %81 : vector<8x512xf32>
    %cst_16 = arith.constant 1.000000e+00 : f32
    %83 = vector.broadcast %cst_16 : f32 to vector<8x512xf32>
    %84 = arith.addf %83, %82 : vector<8x512xf32>
    %85 = math.log %84 : vector<8x512xf32>
    %86 = arith.addf %80, %85 : vector<8x512xf32>
    %87 = vector.extract_strided_slice %23 {offsets = [3, 0], sizes = [1, 512], strides = [1, 1]} : vector<8x512xf32> to vector<1x512xf32>
    %88 = vector.broadcast %87 : vector<1x512xf32> to vector<8x512xf32>
    %89 = arith.addf %88, %23 : vector<8x512xf32>
    %c0_17 = arith.constant 0 : index
    %c1536 = arith.constant 1536 : index
    %90 = vector.load %arg3[%c0_17, %c1536] : memref<8x4096xf32, #tpu.memory_space<vmem>>, vector<8x512xf32>
    %91 = arith.addf %89, %90 : vector<8x512xf32>
    %92 = vector.extract_strided_slice %28 {offsets = [3, 0], sizes = [1, 512], strides = [1, 1]} : vector<8x512xf32> to vector<1x512xf32>
    %93 = vector.broadcast %92 : vector<1x512xf32> to vector<8x512xf32>
    %94 = arith.addf %93, %28 : vector<8x512xf32>
    %c0_18 = arith.constant 0 : index
    %c1536_19 = arith.constant 1536 : index
    %95 = vector.load %arg4[%c0_18, %c1536_19] : memref<8x4096xf32, #tpu.memory_space<vmem>>, vector<8x512xf32>
    %96 = arith.addf %94, %95 : vector<8x512xf32>
    %97 = arith.maximumf %91, %96 : vector<8x512xf32>
    %98 = arith.minimumf %91, %96 : vector<8x512xf32>
    %99 = arith.addf %86, %97 : vector<8x512xf32>
    %100 = arith.subf %98, %97 : vector<8x512xf32>
    %101 = math.exp %100 : vector<8x512xf32>
    %cst_20 = arith.constant 1.000000e+00 : f32
    %102 = vector.broadcast %cst_20 : f32 to vector<8x512xf32>
    %103 = arith.addf %102, %101 : vector<8x512xf32>
    %104 = math.log %103 : vector<8x512xf32>
    %105 = arith.addf %99, %104 : vector<8x512xf32>
    %106 = vector.extract_strided_slice %23 {offsets = [4, 0], sizes = [1, 512], strides = [1, 1]} : vector<8x512xf32> to vector<1x512xf32>
    %107 = vector.broadcast %106 : vector<1x512xf32> to vector<8x512xf32>
    %108 = arith.addf %107, %23 : vector<8x512xf32>
    %c0_21 = arith.constant 0 : index
    %c2048 = arith.constant 2048 : index
    %109 = vector.load %arg3[%c0_21, %c2048] : memref<8x4096xf32, #tpu.memory_space<vmem>>, vector<8x512xf32>
    %110 = arith.addf %108, %109 : vector<8x512xf32>
    %111 = vector.extract_strided_slice %28 {offsets = [4, 0], sizes = [1, 512], strides = [1, 1]} : vector<8x512xf32> to vector<1x512xf32>
    %112 = vector.broadcast %111 : vector<1x512xf32> to vector<8x512xf32>
    %113 = arith.addf %112, %28 : vector<8x512xf32>
    %c0_22 = arith.constant 0 : index
    %c2048_23 = arith.constant 2048 : index
    %114 = vector.load %arg4[%c0_22, %c2048_23] : memref<8x4096xf32, #tpu.memory_space<vmem>>, vector<8x512xf32>
    %115 = arith.addf %113, %114 : vector<8x512xf32>
    %116 = arith.maximumf %110, %115 : vector<8x512xf32>
    %117 = arith.minimumf %110, %115 : vector<8x512xf32>
    %118 = arith.addf %105, %116 : vector<8x512xf32>
    %119 = arith.subf %117, %116 : vector<8x512xf32>
    %120 = math.exp %119 : vector<8x512xf32>
    %cst_24 = arith.constant 1.000000e+00 : f32
    %121 = vector.broadcast %cst_24 : f32 to vector<8x512xf32>
    %122 = arith.addf %121, %120 : vector<8x512xf32>
    %123 = math.log %122 : vector<8x512xf32>
    %124 = arith.addf %118, %123 : vector<8x512xf32>
    %125 = vector.extract_strided_slice %23 {offsets = [5, 0], sizes = [1, 512], strides = [1, 1]} : vector<8x512xf32> to vector<1x512xf32>
    %126 = vector.broadcast %125 : vector<1x512xf32> to vector<8x512xf32>
    %127 = arith.addf %126, %23 : vector<8x512xf32>
    %c0_25 = arith.constant 0 : index
    %c2560 = arith.constant 2560 : index
    %128 = vector.load %arg3[%c0_25, %c2560] : memref<8x4096xf32, #tpu.memory_space<vmem>>, vector<8x512xf32>
    %129 = arith.addf %127, %128 : vector<8x512xf32>
    %130 = vector.extract_strided_slice %28 {offsets = [5, 0], sizes = [1, 512], strides = [1, 1]} : vector<8x512xf32> to vector<1x512xf32>
    %131 = vector.broadcast %130 : vector<1x512xf32> to vector<8x512xf32>
    %132 = arith.addf %131, %28 : vector<8x512xf32>
    %c0_26 = arith.constant 0 : index
    %c2560_27 = arith.constant 2560 : index
    %133 = vector.load %arg4[%c0_26, %c2560_27] : memref<8x4096xf32, #tpu.memory_space<vmem>>, vector<8x512xf32>
    %134 = arith.addf %132, %133 : vector<8x512xf32>
    %135 = arith.maximumf %129, %134 : vector<8x512xf32>
    %136 = arith.minimumf %129, %134 : vector<8x512xf32>
    %137 = arith.addf %124, %135 : vector<8x512xf32>
    %138 = arith.subf %136, %135 : vector<8x512xf32>
    %139 = math.exp %138 : vector<8x512xf32>
    %cst_28 = arith.constant 1.000000e+00 : f32
    %140 = vector.broadcast %cst_28 : f32 to vector<8x512xf32>
    %141 = arith.addf %140, %139 : vector<8x512xf32>
    %142 = math.log %141 : vector<8x512xf32>
    %143 = arith.addf %137, %142 : vector<8x512xf32>
    %144 = vector.extract_strided_slice %23 {offsets = [6, 0], sizes = [1, 512], strides = [1, 1]} : vector<8x512xf32> to vector<1x512xf32>
    %145 = vector.broadcast %144 : vector<1x512xf32> to vector<8x512xf32>
    %146 = arith.addf %145, %23 : vector<8x512xf32>
    %c0_29 = arith.constant 0 : index
    %c3072 = arith.constant 3072 : index
    %147 = vector.load %arg3[%c0_29, %c3072] : memref<8x4096xf32, #tpu.memory_space<vmem>>, vector<8x512xf32>
    %148 = arith.addf %146, %147 : vector<8x512xf32>
    %149 = vector.extract_strided_slice %28 {offsets = [6, 0], sizes = [1, 512], strides = [1, 1]} : vector<8x512xf32> to vector<1x512xf32>
    %150 = vector.broadcast %149 : vector<1x512xf32> to vector<8x512xf32>
    %151 = arith.addf %150, %28 : vector<8x512xf32>
    %c0_30 = arith.constant 0 : index
    %c3072_31 = arith.constant 3072 : index
    %152 = vector.load %arg4[%c0_30, %c3072_31] : memref<8x4096xf32, #tpu.memory_space<vmem>>, vector<8x512xf32>
    %153 = arith.addf %151, %152 : vector<8x512xf32>
    %154 = arith.maximumf %148, %153 : vector<8x512xf32>
    %155 = arith.minimumf %148, %153 : vector<8x512xf32>
    %156 = arith.addf %143, %154 : vector<8x512xf32>
    %157 = arith.subf %155, %154 : vector<8x512xf32>
    %158 = math.exp %157 : vector<8x512xf32>
    %cst_32 = arith.constant 1.000000e+00 : f32
    %159 = vector.broadcast %cst_32 : f32 to vector<8x512xf32>
    %160 = arith.addf %159, %158 : vector<8x512xf32>
    %161 = math.log %160 : vector<8x512xf32>
    %162 = arith.addf %156, %161 : vector<8x512xf32>
    %163 = vector.extract_strided_slice %23 {offsets = [7, 0], sizes = [1, 512], strides = [1, 1]} : vector<8x512xf32> to vector<1x512xf32>
    %164 = vector.broadcast %163 : vector<1x512xf32> to vector<8x512xf32>
    %165 = arith.addf %164, %23 : vector<8x512xf32>
    %c0_33 = arith.constant 0 : index
    %c3584 = arith.constant 3584 : index
    %166 = vector.load %arg3[%c0_33, %c3584] : memref<8x4096xf32, #tpu.memory_space<vmem>>, vector<8x512xf32>
    %167 = arith.addf %165, %166 : vector<8x512xf32>
    %168 = vector.extract_strided_slice %28 {offsets = [7, 0], sizes = [1, 512], strides = [1, 1]} : vector<8x512xf32> to vector<1x512xf32>
    %169 = vector.broadcast %168 : vector<1x512xf32> to vector<8x512xf32>
    %170 = arith.addf %169, %28 : vector<8x512xf32>
    %c0_34 = arith.constant 0 : index
    %c3584_35 = arith.constant 3584 : index
    %171 = vector.load %arg4[%c0_34, %c3584_35] : memref<8x4096xf32, #tpu.memory_space<vmem>>, vector<8x512xf32>
    %172 = arith.addf %170, %171 : vector<8x512xf32>
    %173 = arith.maximumf %167, %172 : vector<8x512xf32>
    %174 = arith.minimumf %167, %172 : vector<8x512xf32>
    %175 = arith.addf %162, %173 : vector<8x512xf32>
    %176 = arith.subf %174, %173 : vector<8x512xf32>
    %177 = math.exp %176 : vector<8x512xf32>
    %cst_36 = arith.constant 1.000000e+00 : f32
    %178 = vector.broadcast %cst_36 : f32 to vector<8x512xf32>
    %179 = arith.addf %178, %177 : vector<8x512xf32>
    %180 = math.log %179 : vector<8x512xf32>
    %181 = arith.addf %175, %180 : vector<8x512xf32>
    %cst_37 = arith.constant dense<0.000000e+00> : vector<512xf32>
    %182 = vector.multi_reduction <add>, %181, %cst_37 [0] : vector<8x512xf32> to vector<512xf32>
    %183 = vector.shape_cast %182 : vector<512xf32> to vector<1x512xf32>
    %c0_38 = arith.constant 0 : index
    %184 = arith.index_cast %8 : i32 to index
    %185 = vector.load %arg5[%c0_38, %184] : memref<1x512xf32, #tpu.memory_space<vmem>>, vector<1x512xf32>
    tpu.vector_store %arg5[%c0_38, %184], %183 {strides = array<i32>} : memref<1x512xf32, #tpu.memory_space<vmem>>, vector<1x512xf32>,
    %c1_i32 = arith.constant 1 : i32
    return
  }
  func.func @transform_0(%arg0: i32) -> (i32, i32) {
    %c0_i32 = arith.constant 0 : i32
    %c0_i32_0 = arith.constant 0 : i32
    return %c0_i32, %arg0 : i32, i32
  }
  func.func @transform_1(%arg0: i32) -> (i32, i32) {
    %c0_i32 = arith.constant 0 : i32
    %c0_i32_0 = arith.constant 0 : i32
    %c0_i32_1 = arith.constant 0 : i32
    return %c0_i32, %c0_i32_0 : i32, i32
  }
  func.func @transform_2(%arg0: i32) -> (i32, i32) {
    %c0_i32 = arith.constant 0 : i32
    %c0_i32_0 = arith.constant 0 : i32
    %c0_i32_1 = arith.constant 0 : i32
    return %c0_i32, %c0_i32_0 : i32, i32
  }
  func.func @transform_3(%arg0: i32) -> (i32, i32) {
    %c0_i32 = arith.constant 0 : i32
    %c0_i32_0 = arith.constant 0 : i32
    %c0_i32_1 = arith.constant 0 : i32
    return %c0_i32, %c0_i32_0 : i32, i32
  }
  func.func @transform_4(%arg0: i32) -> (i32, i32) {
    %c0_i32 = arith.constant 0 : i32
    %c0_i32_0 = arith.constant 0 : i32
    return %c0_i32, %arg0 : i32, i32
  }
}

</mosaic_0001>

<bundles_post_ra>
// kernel: tpu_custom_call.1
= control target key start
LH: loop header
LB: loop body
LE: loop exit
PB: predicated region body
PF: predicated region fallthrough
CT: control target
= control target key end

     0   :  { %9 = vsyncpa [#allocation3], 0  ;;  %s2358_s0 = inlined_call_operand.hbm [shape: f32[8,1000], index: 0, kind: input, shape index: {}]   ;;  %s2359_s1 = inlined_call_operand.hbm [shape: f32[8,8], index: 1, kind: input, shape index: {}]   ;;  %s2360_s2 = inlined_call_operand.hbm [shape: f32[8,4096], index: 2, kind: input, shape index: {}]   ;;  %s2361_s3 = inlined_call_operand.hbm [shape: f32[8,4096], index: 3, kind: input, shape index: {}]   ;;  %s2362_s4 = inlined_call_operand.hbm [shape: f32[1,1000], index: 4, kind: output, shape index: {}]  }
   0x1   :  { %11 = vsyncpa [#allocation3 + $0x1], 0 }
   0x2   :  { %12 = vsyncpa [#allocation6], 0 }
   0x3   :  { %13 = vsyncpa [#allocation9], 0 }
   0x4   :  { %14 = vsyncpa [#allocation4], 0 }
   0x5   :  { %16 = vsyncpa [#allocation4 + $0x1], 0  ;;  %s1731_s15 = smov 0   ;;  %s1733_s16 = smov 0  }
   0x6   :  { %s1735_s17 = smov 0   ;;  %s1737_s18 = smov 0  }
   0x7 LB: > { %s1752_s19 = sadd.s32 4294967295, %s1692_s18   ;;  %s1264_s20 = sadd.s32 4294967294, %s1692_s18   ;;  %s1692_s18 = sphi %s1737_s18, %s2385_s18   ;;  %s1688_s17 = sphi %s1735_s17, %s2384_s17   ;;  %s1684_s16 = sphi %s1733_s16, %s2383_s16   ;;  %s1680_s15 = sphi %s1731_s15, %s2382_s15  }
   0x8   : > { %p42_p0 = scmp.ne.s32.totalorder %s1684_s16, %s1680_s15  ;;  %p2363_p1 = scmp.eq.s32.totalorder %s1752_s19, 0 }
   0x9   : > { %p135_p3 = scmp.eq.s32.totalorder %s1264_s20, 1  ;;  %p1265_p5 = scmp.ge.s32.totalorder %s1692_s18, 1 }
   0xa   : > { %p1761_p4 = por %p2363_p1, %p42_p0  ;;  %p142_p7 = scmp.lt.s32.totalorder %s1692_s18, 3 }
   0xb   : > { %p1766_p6 = por %p135_p3, %p42_p0  ;;  %s1694_s24 = smov [#allocation5]  }
   0xc   : > { %s2366_s21 = scalar_select %p1761_p4, 1, 0 }
   0xd   : > { %s2367_s22 = scalar_select %p1766_p6, 1, 0 }
   0xe   : > { %p1771_p8 = pnand %p1265_p5, %p142_p7  ;;  %s155_s25 = sshll.u32 %s1694_s24, 4  ;;  %s156_s25 = int_to_ptr.vmem [resolvable:$true] %s155_s25 }
   0xf   : > { %s1695_s26 = smov [#allocation7]   ;;  %s1696_s29 = smov [#allocation8]  }
  0x10   : > { %s2368_s23 = scalar_select %p1771_p8, 1, 0 }
  0x11   : > { %p1302_p10 = pneg %p1771_p8  ;;  %s166_s27 = sshll.u32 %s1695_s26, 4  ;;  %s1784_s27 = int_to_ptr.vmem [resolvable:$true] %s166_s27 }
  0x12   : > { %s177_s30 = sshll.u32 %s1696_s29, 4  ;;  %s1504_s7 = scalar_lea.hbm %s2359_s1, 128  ;;  %s1786_s30 = int_to_ptr.vmem [resolvable:$true] %s177_s30 }
  0x13   : > { %p1780_p11 = pnand %p1302_p10, %p2363_p1  ;;  %p1505_p12 = scmp.ne.s32.totalorder %s2359_s1, %s1504_s7 }
  0x14   : > { %p1511_p5 = scmp.lt.u32.totalorder %s1504_s7, %s2359_s1 }
  0x15   : > { %p1796_p13 = pneg %p1780_p11 }
  0x17   : > { %p1507_p0 = pnand %p1796_p13, %p1505_p12 }
  0x19   : > { %p1508_p3 = pneg %p1507_p0 }
  0x1b   : > { %p1513_p7 = pnand %p1511_p5, %p1508_p3 }
  0x1d   : > { %1516 = shalt.err (!%p1513_p7)
}
  0x1e   : > { %s1517_s13 = scalar_lea.vmem %s156_s25, 128  ;;  %p1525_p2 = scmp.lt.s32.totalorder %s156_s25, %s156_s25 }
  0x1f   : > { %p1518_p10 = scmp.ne.s32.totalorder %s156_s25, %s1517_s13  ;;  %p1526_p6 = scmp.lt.s32.totalorder %s1517_s13, %s1517_s13 }
  0x21   : > { %p1520_p9 = pnand %p1518_p10, %p1796_p13  ;;  %p1527_p4 = por %p1526_p6, %p1525_p2 }
  0x23   : > { %p1521_p1 = pneg %p1520_p9 }
  0x25   : > { %p1528_p8 = pnand %p1527_p4, %p1521_p1 }
  0x27   : > { %1531 = shalt.err (!%p1528_p8)
}
  0x28   : > { %1305 = dma.hbm_to_vmem [thread:$0]  (!%p1780_p11), %s2359_s1, 128, %s156_s25, [#allocation6]  }
  0x29   : > { %s1532_s29 = scalar_lea.hbm %s2360_s2, 4096 }
  0x2a   : > { %p1533_p9 = scmp.ne.s32.totalorder %s2360_s2, %s1532_s29  ;;  %p1539_p1 = scmp.lt.u32.totalorder %s1532_s29, %s2360_s2 }
  0x2c   : > { %p1535_p12 = pnand %p1533_p9, %p1796_p13 }
  0x2e   : > { %p1536_p2 = pneg %p1535_p12 }
  0x30   : > { %p1541_p4 = pnand %p1539_p1, %p1536_p2 }
  0x32   : > { %1544 = shalt.err (!%p1541_p4)
}
  0x33   : > { %s1545_s25 = scalar_lea.vmem %s1784_s27, 4096  ;;  %p1553_p3 = scmp.lt.s32.totalorder %s1784_s27, %s1784_s27 }
  0x34   : > { %p1546_p6 = scmp.ne.s32.totalorder %s1784_s27, %s1545_s25  ;;  %p1554_p5 = scmp.lt.s32.totalorder %s1545_s25, %s1545_s25 }
  0x36   : > { %p1548_p8 = pnand %p1546_p6, %p1796_p13  ;;  %p1555_p7 = por %p1554_p5, %p1553_p3 }
  0x38   : > { %p1549_p0 = pneg %p1548_p8 }
  0x3a   : > { %p1556_p10 = pnand %p1555_p7, %p1549_p0 }
  0x3c   : > { %1559 = shalt.err (!%p1556_p10)
}
  0x3d   : > { %1308 = dma.hbm_to_vmem [thread:$0]  (!%p1780_p11), %s2360_s2, 4096, %s1784_s27, [#allocation6]  }
  0x3e   : > { %s1560_s14 = scalar_lea.hbm %s2361_s3, 4096 }
  0x3f   : > { %p1561_p9 = scmp.ne.s32.totalorder %s2361_s3, %s1560_s14  ;;  %p1567_p1 = scmp.lt.u32.totalorder %s1560_s14, %s2361_s3 }
  0x41   : > { %p1563_p12 = pnand %p1561_p9, %p1796_p13 }
  0x43   : > { %p1564_p2 = pneg %p1563_p12 }
  0x45   : > { %p1569_p4 = pnand %p1567_p1, %p1564_p2 }
  0x47   : > { %1572 = shalt.err (!%p1569_p4)
}
  0x48   : > { %s1573_s27 = scalar_lea.vmem %s1786_s30, 4096  ;;  %p1581_p3 = scmp.lt.s32.totalorder %s1786_s30, %s1786_s30 }
  0x49   : > { %p1574_p6 = scmp.ne.s32.totalorder %s1786_s30, %s1573_s27  ;;  %p1582_p5 = scmp.lt.s32.totalorder %s1573_s27, %s1573_s27 }
  0x4b   : > { %p1576_p8 = pnand %p1574_p6, %p1796_p13  ;;  %p1583_p7 = por %p1582_p5, %p1581_p3 }
  0x4d   : > { %p1577_p0 = pneg %p1576_p8 }
  0x4f   : > { %p1584_p10 = pnand %p1583_p7, %p1577_p0 }
  0x51   : > { %1587 = shalt.err (!%p1584_p10)
}
  0x52   : > { %1311 = dma.hbm_to_vmem [thread:$0]  (!%p1780_p11), %s2361_s3, 4096, %s1786_s30, [#allocation9]  }
  0x53   : > { %s1859_s10 = sadd.s32 1, %s1692_s18   ;;  %s29_s7 = sadd.s32 1, %s1688_s17 }
  0x54   : > { %s26_s28 = ssub.s32 %s1692_s18, %s1859_s10  ;;  %p36_p9 = scmp.ne.s32.totalorder %s1688_s17, %s1684_s16 }
  0x55   : > { %p27_p13 = scmp.eq.s32.totalorder %s26_s28, 0  ;;  %p37_p12 = scmp.eq.s32.totalorder %s1692_s18, 0 }
  0x56   : > { %p1323_p2 = scmp.lt.s32.totalorder %s1692_s18, 2  ;;  %p2371_p4 = scmp.eq.s32.totalorder %s1752_s19, 1 }
  0x57   : > { %s1869_s8 = scalar_select %p27_p13, %s1688_s17, %s29_s7  }
  0x58   : > { %p38_p1 = por %p37_p12, %p36_p9  ;;  %p1873_p6 = por %p2371_p4, %p36_p9 }
  0x59   : > { %s188_s9 = sand.u32 1, %s1688_s17   ;;  %s1284_s11 = sshll.u32 %s1692_s18, 9 }
  0x5a   : > { %s1270_s30 = sshll.u32 %s188_s9, 5  ;;  %s1882_s14 = scalar_lea.hbm %s2358_s0, %s1284_s11 }
  0x5b   : > { %s192_s20 = scalar_lea.vmem [#allocation2], %s1270_s30  ;;  %p1884_p11 = pnand %p1323_p2, %p38_p1 }
  0x5c   : > { %s200_s24 = sshll.u32 %s192_s20, 4  ;;  %s189_s29 = scalar_lea.sflag [#allocation3], %s188_s9  ;;  %s1888_s24 = int_to_ptr.vmem [resolvable:$true] %s200_s24 }
  0x5d   : > { %s1588_s27 = scalar_lea.hbm %s1882_s14, 512  ;;  %p1590_p0 = pneg %p1884_p11 }
  0x5e   : > { %p1589_p8 = scmp.ne.s32.totalorder %s1882_s14, %s1588_s27  ;;  %s1593_s28 = scalar_lea.hbm %s2358_s0, 1024 }
  0x5f   : > { %p1594_p7 = scmp.lt.u32.totalorder %s1882_s14, %s2358_s0  ;;  %p1595_p10 = scmp.lt.u32.totalorder %s1593_s28, %s1588_s27 }
  0x60   : > { %p1591_p3 = pnand %p1590_p0, %p1589_p8  ;;  %p1597_p9 = scmp.lt.u32.totalorder %s1588_s27, %s1882_s14 }
  0x61   : > { %p1596_p13 = por %p1595_p10, %p1594_p7 }
  0x62   : > { %p1592_p5 = pneg %p1591_p3 }
  0x63   : > { %p1598_p12 = por %p1597_p9, %p1596_p13 }
  0x65   : > { %p1599_p2 = pnand %p1598_p12, %p1592_p5 }
  0x67   : > { %1602 = shalt.err (!%p1599_p2)
}
  0x68   : > { %s1603_s9 = scalar_lea.vmem %s1888_s24, 512  ;;  %s1697_s30 = smov [#allocation2]  }
  0x69   : > { %p1604_p1 = scmp.ne.s32.totalorder %s1888_s24, %s1603_s9  ;;  %s1608_s12 = sshll.u32 %s1697_s30, 4  ;;  %s1609_s12 = int_to_ptr.vmem [resolvable:$false] %s1608_s12 }
  0x6a   : > { %s1610_s13 = scalar_lea.vmem %s1609_s12, 1024  ;;  %p1611_p3 = scmp.lt.s32.totalorder %s1888_s24, %s1609_s12 }
  0x6b   : > { %p1606_p4 = pnand %p1604_p1, %p1590_p0  ;;  %p1612_p7 = scmp.lt.s32.totalorder %s1610_s13, %s1603_s9 }
  0x6d   : > { %p1607_p8 = pneg %p1606_p4  ;;  %p1613_p10 = por %p1612_p7, %p1611_p3 }
  0x6f   : > { %p1614_p13 = pnand %p1613_p10, %p1607_p8 }
  0x71   : > { %1617 = shalt.err (!%p1614_p13)
}
  0x72   : > { %1315 = dma.hbm_to_vmem [thread:$0]  (!%p1884_p11), %s1882_s14, 512, %s1888_s24, %s189_s29  }
  0x73   : > { %p2374_p5 = scmp.ne.s32.totalorder %s2368_s23, 0 }
  0x74   : > { %s1918_s20 = sand.u32 (!%p2374_p5), 1, %s1684_s16   ;;  %p2375_p0 = scmp.ne.s32.totalorder (!%p2374_p5), %s2366_s21, 0 }
  0x75   : > { %209 = sbr.rel (%p2374_p5) target bundleno = 453 (0x1c5), region = 36  ;;  %s1274_s27 = sshll.u32 (!%p2374_p5), %s1918_s20, 5 }
  0x76   : > { %s212_s5 = scalar_lea.sflag (!%p2374_p5), [#allocation3], %s1918_s20  ;;  %s215_s6 = scalar_lea.vmem (!%p2374_p5), [#allocation2], %s1274_s27 }
  0x7c   : > { %1663 = dma.done.wait (%p2375_p0), %s212_s5, 512  }
  0x7d   : > { %1665 = vsyncadd (%p2375_p0), %s212_s5, 4294966784  ;;  %p2376_p9 = scmp.eq.s32.totalorder %s1752_s19, 0 }
  0x7f   : > { %1667 = dma.done.wait (%p2376_p9), [#allocation6], 4224   ;;  %p2377_p11 = pmov %p2376_p9 }
  0x80   : > { %p2378_p12 = pmov %p2376_p9 }
  0x81   : > { %1669 = vsyncadd (%p2377_p11), [#allocation6], 4294963072 }
  0x82   : > { %1671 = dma.done.wait (%p2378_p12), [#allocation9], 4096   ;;  %p2379_p2 = pmov %p2376_p9 }
  0x83   : > { %v1698_v0 = vmov 1   ;;  %v1699_v1 = vmov 0   ;;  %v254_v2 = vld [vmem:[#allocation5] sm:$0xff]  ;;  %v1700_v3 = vmov 4   ;;  %v1701_v4 = vmov 3   ;;  %v256_v8 = vld [vmem:[%s215_s6 + $0x8] sm:$0xff] }
  0x84   : > { %1673 = vsyncadd (%p2379_p2), [#allocation9], 4294963200  ;;  %1372 = vset.pattern.permute.xlu1 %v1698_v0  ;;  %1370 = vset.pattern.permute.xlu0 %v1699_v1  ;;  %v1702_v5 = vmov 2   ;;  %v1703_v6 = vmov 5   ;;  %v255_v7 = vld [vmem:[%s215_s6] sm:$0xff]  ;;  %v257_v9 = vld [vmem:[%s215_s6 + $0x10] sm:$0xff]  ;;  %v324_v11 = vlaneseq }
  0x85   : > { %269 = vperm.xlu1 %1372, %v254_v2   ;;  %261 = vperm.xlu0 %1370, %v254_v2   ;;  %v258_v10 = vld [vmem:[%s215_s6 + $0x18] sm:$0xff]  ;;  %v344_v61 = vld [vmem:[#allocation7] sm:$0xff]  ;;  %s1278_s21 = sshll.u32 %s1918_s20, 2  ;;  %s1285_s23 = sshll.u32 %s1752_s19, 6 }
  0x86   : > { %v1935_v18 = vshrl.u32 %v324_v11, 7  ;;  %s251_s14 = scalar_lea.vmem [#allocation10], %s1278_s21  ;;  %vm1147_vm0 = vcmp.lt.s32.totalorder %v324_v11, 512  ;;  %s2314_s28 = scalar_lea.hbm %s2362_s4, %s1285_s23 }
  0x87   : > { %s1165_s24 = sshll.u32 %s251_s14, 4  ;;  %s1151_s7 = scalar_lea.sflag [#allocation4], %s1918_s20  ;;  %s2316_s24 = int_to_ptr.vmem [resolvable:$true] %s1165_s24 }
  0x88   : > { %v326_v33 = vsub.s32 0, %v1935_v18  ;;  %v1939_v34 = vsub.s32 1, %v1935_v18  ;;  %s1618_s11 = scalar_lea.vmem %s2316_s24, 64  ;;  %s1705_s19 = smov [#allocation10]  }
  0x89   : > { %1373 = vset.pattern.permute.xlu1 %v1700_v3  ;;  %1371 = vset.pattern.permute.xlu0 %v1701_v4  ;;  %v346_v3 = vld [vmem:[#allocation7 + $0x10] sm:$0xff]  ;;  %v347_v4 = vld [vmem:[#allocation7 + $0x18] sm:$0xff]  ;;  %p1619_p1 = scmp.ne.s32.totalorder %s2316_s24, %s1618_s11  ;;  %s1622_s9 = sshll.u32 %s1705_s19, 4  ;;  %s1623_s9 = int_to_ptr.vmem [resolvable:$false] %s1622_s9 }
  0x8a   : > { %285 = vperm.xlu1 %1373, %v254_v2   ;;  %277 = vperm.xlu0 %1371, %v254_v2   ;;  %s1624_s30 = scalar_lea.vmem %s1623_s9, 128  ;;  %p1625_p3 = scmp.lt.s32.totalorder %s2316_s24, %s1623_s9 }
  0x8b   : > { %p1620_p4 = pnand %p1619_p1, %p1873_p6  ;;  %p1626_p7 = scmp.lt.s32.totalorder %s1624_s30, %s1618_s11 }
  0x8d   : > { %p1621_p8 = pneg %p1620_p4  ;;  %p1627_p10 = por %p1626_p7, %p1625_p3 }
  0x8e   : > { %1374 = vset.pattern.permute.xlu1 %v1702_v5  ;;  %1375 = vset.pattern.permute.xlu0 %v1703_v6 }
  0x8f   : > { %301 = vperm.xlu1 %1374, %v254_v2   ;;  %317 = vperm.xlu0 %1375, %v254_v2   ;;  %v345_v2 = vld [vmem:[#allocation7 + $0x8] sm:$0xff]  ;;  %p1628_p13 = pnand %p1627_p10, %p1621_p8 }
 0x104   : > { %v262_v12 = vpop.permute.xlu0 %261  ;;  %v270_v13 = vpop.permute.xlu1 %269 }
 0x105   : > { %v264_v14 = vsub.f32 %v255_v7, %v262_v12  ;;  %v265_v15 = vsub.f32 %v256_v8, %v262_v12  ;;  %v266_v16 = vsub.f32 %v257_v9, %v262_v12  ;;  %v267_v17 = vsub.f32 %v258_v10, %v262_v12 }
 0x107   : > { %v272_v19 = vmul.f32 %v270_v13, %v264_v14  ;;  %v273_v20 = vmul.f32 %v270_v13, %v265_v15  ;;  %v274_v21 = vmul.f32 %v270_v13, %v266_v16  ;;  %v275_v22 = vmul.f32 %v270_v13, %v267_v17  ;;  %v372_v14 = vld [vmem:[#allocation8] sm:$0xff] }
 0x109   : > { %v278_v23 = vpop.permute.xlu0 %277  ;;  %v286_v24 = vpop.permute.xlu1 %285  ;;  %v292_v25 = vmul.f32 0.5, %v272_v19  ;;  %v293_v26 = vmul.f32 0.5, %v273_v20  ;;  %v294_v27 = vmul.f32 0.5, %v274_v21  ;;  %v295_v28 = vmul.f32 0.5, %v275_v22 }
 0x10a   : > { %v280_v29 = vsub.f32 %v255_v7, %v278_v23  ;;  %v281_v30 = vsub.f32 %v256_v8, %v278_v23  ;;  %v282_v31 = vsub.f32 %v257_v9, %v278_v23  ;;  %v283_v32 = vsub.f32 %v258_v10, %v278_v23 }
 0x10b   : > { %v296_v39 = vmul.f32 %v292_v25, %v272_v19  ;;  %v297_v40 = vmul.f32 %v293_v26, %v273_v20  ;;  %v298_v41 = vmul.f32 %v294_v27, %v274_v21  ;;  %v299_v42 = vmul.f32 %v295_v28, %v275_v22  ;;  %v373_v20 = vld [vmem:[#allocation8 + $0x8] sm:$0xff]  ;;  %v374_v21 = vld [vmem:[#allocation8 + $0x10] sm:$0xff]  ;;  %v375_v22 = vld [vmem:[#allocation8 + $0x18] sm:$0xff] }
 0x10c   : > { %v288_v35 = vmul.f32 %v286_v24, %v280_v29  ;;  %v289_v36 = vmul.f32 %v286_v24, %v281_v30  ;;  %v290_v37 = vmul.f32 %v286_v24, %v282_v31  ;;  %v291_v38 = vmul.f32 %v286_v24, %v283_v32 }
 0x10e   : > { %v302_v43 = vpop.permute.xlu1 %301  ;;  %v308_v44 = vmul.f32 0.5, %v288_v35  ;;  %v309_v45 = vmul.f32 0.5, %v289_v36  ;;  %v310_v46 = vmul.f32 0.5, %v290_v37  ;;  %v311_v47 = vmul.f32 0.5, %v291_v38  ;;  %v318_v52 = vpop.permute.xlu0 %317 }
 0x10f   : > { %v1941_v48 = vsub.f32 %v302_v43, %v296_v39  ;;  %v1943_v49 = vsub.f32 %v302_v43, %v297_v40  ;;  %v1945_v50 = vsub.f32 %v302_v43, %v298_v41  ;;  %v1947_v51 = vsub.f32 %v302_v43, %v299_v42 }
 0x110   : > { %v312_v53 = vmul.f32 %v308_v44, %v288_v35  ;;  %v313_v54 = vmul.f32 %v309_v45, %v289_v36  ;;  %v314_v55 = vmul.f32 %v310_v46, %v290_v37  ;;  %v315_v56 = vmul.f32 %v311_v47, %v291_v38 }
 0x111   : > { %v327_v57 = vrot.slane %v1941_v48, %v326_v33  ;;  %v331_v58 = vrot.slane %v1943_v49, %v326_v33  ;;  %v335_v59 = vrot.slane %v1945_v50, %v326_v33  ;;  %v339_v60 = vrot.slane %v1947_v51, %v326_v33 }
 0x112   : > { %v1953_v62 = vsub.f32 %v318_v52, %v312_v53  ;;  %v1955_v63 = vsub.f32 %v318_v52, %v313_v54  ;;  %v1957_v0 = vsub.f32 %v318_v52, %v314_v55  ;;  %v1959_v1 = vsub.f32 %v318_v52, %v315_v56  ;;  %v440_v52 = vld [vmem:[#allocation7 + $0x20] sm:$0xff] }
 0x113   : > { %v340_v5 = vadd.f32 %v327_v57, %v1941_v48  ;;  %v341_v6 = vadd.f32 %v331_v58, %v1943_v49  ;;  %v342_v7 = vadd.f32 %v335_v59, %v1945_v50  ;;  %v343_v8 = vadd.f32 %v339_v60, %v1947_v51  ;;  %v441_v58 = vld [vmem:[#allocation7 + $0x28] sm:$0xff]  ;;  %v442_v59 = vld [vmem:[#allocation7 + $0x30] sm:$0xff] }
 0x114   : > { %v355_v9 = vrot.slane %v1953_v62, %v326_v33  ;;  %v359_v10 = vrot.slane %v1955_v63, %v326_v33  ;;  %v363_v12 = vrot.slane %v1957_v0, %v326_v33  ;;  %v367_v13 = vrot.slane %v1959_v1, %v326_v33 }
 0x115   : > { %v348_v15 = vadd.f32 %v344_v61, %v340_v5  ;;  %v349_v16 = vadd.f32 %v345_v2, %v341_v6  ;;  %v350_v17 = vadd.f32 %v346_v3, %v342_v7  ;;  %v351_v19 = vadd.f32 %v347_v4, %v343_v8  ;;  %v468_v4 = vld [vmem:[#allocation8 + $0x20] sm:$0xff]  ;;  %v469_v5 = vld [vmem:[#allocation8 + $0x28] sm:$0xff]  ;;  %v470_v6 = vld [vmem:[#allocation8 + $0x30] sm:$0xff] }
 0x116   : > { %v368_v23 = vadd.f32 %v355_v9, %v1953_v62  ;;  %v369_v24 = vadd.f32 %v359_v10, %v1955_v63  ;;  %v370_v25 = vadd.f32 %v363_v12, %v1957_v0  ;;  %v371_v26 = vadd.f32 %v367_v13, %v1959_v1 }
 0x117   : > { %v423_v27 = vrot.slane %v1941_v48, %v1939_v34  ;;  %v427_v28 = vrot.slane %v1943_v49, %v1939_v34  ;;  %v431_v29 = vrot.slane %v1945_v50, %v1939_v34  ;;  %v435_v30 = vrot.slane %v1947_v51, %v1939_v34 }
 0x118   : > { %v376_v31 = vadd.f32 %v372_v14, %v368_v23  ;;  %v377_v32 = vadd.f32 %v373_v20, %v369_v24  ;;  %v378_v33 = vadd.f32 %v374_v21, %v370_v25  ;;  %v379_v35 = vadd.f32 %v375_v22, %v371_v26  ;;  %v443_v23 = vld [vmem:[#allocation7 + $0x38] sm:$0xff] }
 0x119   : > { %v436_v36 = vadd.f32 %v423_v27, %v1941_v48  ;;  %v437_v45 = vadd.f32 %v427_v28, %v1943_v49  ;;  %v438_v46 = vadd.f32 %v431_v29, %v1945_v50  ;;  %v439_v47 = vadd.f32 %v435_v30, %v1947_v51 }
 0x11a   : > { %v1982_v37 = vmax.f32 %v348_v15, %v376_v31  ;;  %v1984_v38 = vmax.f32 %v349_v16, %v377_v32  ;;  %v1986_v39 = vmax.f32 %v350_v17, %v378_v33  ;;  %v1988_v40 = vmax.f32 %v351_v19, %v379_v35 }
 0x11b   : > { %v384_v41 = vmin.f32 %v348_v15, %v376_v31  ;;  %v385_v42 = vmin.f32 %v349_v16, %v377_v32  ;;  %v386_v43 = vmin.f32 %v350_v17, %v378_v33  ;;  %v387_v44 = vmin.f32 %v351_v19, %v379_v35  ;;  %v471_v16 = vld [vmem:[#allocation8 + $0x38] sm:$0xff] }
 0x11c   : > { %v1994_v53 = vsub.s32 2, %v1935_v18  ;;  %v451_v60 = vrot.slane %v1953_v62, %v1939_v34  ;;  %v455_v61 = vrot.slane %v1955_v63, %v1939_v34  ;;  %v459_v2 = vrot.slane %v1957_v0, %v1939_v34 }
 0x11d   : > { %v392_v54 = vsub.f32 %v384_v41, %v1982_v37  ;;  %v393_v55 = vsub.f32 %v385_v42, %v1984_v38  ;;  %v394_v56 = vsub.f32 %v386_v43, %v1986_v39  ;;  %v395_v57 = vsub.f32 %v387_v44, %v1988_v40 }
 0x11e   : > { %v463_v3 = vrot.slane %v1959_v1, %v1939_v34  ;;  %v444_v10 = vadd.f32 %v440_v52, %v436_v36  ;;  %v464_v13 = vadd.f32 %v451_v60, %v1953_v62  ;;  %v465_v14 = vadd.f32 %v455_v61, %v1955_v63  ;;  %v536_v52 = vld [vmem:[#allocation7 + $0x40] sm:$0xff] }
 0x11f   : > { %v396_v7 = vmul.f32 1.442695, %v392_v54  ;;  %v398_v8 = vmul.f32 1.442695, %v393_v55  ;;  %v400_v9 = vmul.f32 1.442695, %v394_v56  ;;  %v466_v15 = vadd.f32 %v459_v2, %v1957_v0 }
 0x120   : > { %v402_v12 = vmul.f32 1.442695, %v395_v57  ;;  %v445_v17 = vadd.f32 %v441_v58, %v437_v45  ;;  %v446_v19 = vadd.f32 %v442_v59, %v438_v46  ;;  %v467_v34 = vadd.f32 %v463_v3, %v1959_v1  ;;  %v564_v58 = vld [vmem:[#allocation8 + $0x40] sm:$0xff]  ;;  %v537_v2 = vld [vmem:[#allocation7 + $0x48] sm:$0xff] }
 0x121   : > { %1376 = vpow2.f32 %v396_v7  ;;  %v472_v20 = vadd.f32 %v468_v4, %v464_v13  ;;  %v473_v21 = vadd.f32 %v469_v5, %v465_v14  ;;  %v474_v22 = vadd.f32 %v470_v6, %v466_v15  ;;  %v565_v5 = vld [vmem:[#allocation8 + $0x48] sm:$0xff] }
 0x122   : > { %1378 = vpow2.f32 %v398_v8  ;;  %v475_v24 = vadd.f32 %v471_v16, %v467_v34  ;;  %v519_v25 = vrot.slane %v1941_v48, %v1994_v53  ;;  %v447_v32 = vadd.f32 %v443_v23, %v439_v47 }
 0x123   : > { %1380 = vpow2.f32 %v400_v9  ;;  %v2014_v26 = vmax.f32 %v444_v10, %v472_v20  ;;  %v2016_v27 = vmax.f32 %v445_v17, %v473_v21  ;;  %v2018_v28 = vmax.f32 %v446_v19, %v474_v22 }
 0x124   : > { %1382 = vpow2.f32 %v402_v12  ;;  %v480_v29 = vmin.f32 %v444_v10, %v472_v20  ;;  %v481_v30 = vmin.f32 %v445_v17, %v473_v21  ;;  %v482_v31 = vmin.f32 %v446_v19, %v474_v22  ;;  %v566_v19 = vld [vmem:[#allocation8 + $0x50] sm:$0xff] }
 0x125   : > { %v523_v33 = vrot.slane %v1943_v49, %v1994_v53  ;;  %v2025_v42 = vmax.f32 %v447_v32, %v475_v24  ;;  %v483_v43 = vmin.f32 %v447_v32, %v475_v24  ;;  %v527_v44 = vrot.slane %v1945_v50, %v1994_v53 }
 0x126   : > { %v488_v35 = vsub.f32 %v480_v29, %v2014_v26  ;;  %v489_v36 = vsub.f32 %v481_v30, %v2016_v27  ;;  %v490_v41 = vsub.f32 %v482_v31, %v2018_v28  ;;  %v532_v45 = vadd.f32 %v519_v25, %v1941_v48  ;;  %v538_v25 = vld [vmem:[#allocation7 + $0x50] sm:$0xff]  ;;  %v567_v29 = vld [vmem:[#allocation8 + $0x58] sm:$0xff] }
 0x127   : > { %v547_v47 = vrot.slane %v1953_v62, %v1994_v53  ;;  %v533_v55 = vadd.f32 %v523_v33, %v1943_v49  ;;  %v551_v56 = vrot.slane %v1955_v63, %v1994_v53  ;;  %v555_v57 = vrot.slane %v1957_v0, %v1994_v53 }
 0x128   : > { %v492_v46 = vmul.f32 1.442695, %v488_v35  ;;  %v494_v54 = vmul.f32 1.442695, %v489_v36  ;;  %v496_v60 = vmul.f32 1.442695, %v490_v41  ;;  %v531_v61 = vrot.slane %v1947_v51, %v1994_v53 }
 0x129   : > { %v559_v3 = vrot.slane %v1959_v1, %v1994_v53  ;;  %v560_v4 = vadd.f32 %v547_v47, %v1953_v62  ;;  %v491_v7 = vsub.f32 %v483_v43, %v2025_v42  ;;  %v534_v8 = vadd.f32 %v527_v44, %v1945_v50  ;;  %v539_v36 = vld [vmem:[#allocation7 + $0x58] sm:$0xff] }
 0x12a   : > { %v540_v9 = vadd.f32 %v536_v52, %v532_v45  ;;  %v561_v10 = vadd.f32 %v551_v56, %v1955_v63  ;;  %1384 = vpow2.f32 %v492_v46  ;;  %v562_v14 = vadd.f32 %v555_v57, %v1957_v0 }
 0x12b   : > { %v1377_v59 = vpop.eup %1376  ;;  %v568_v15 = vadd.f32 %v564_v58, %v560_v4  ;;  %1386 = vpow2.f32 %v494_v54  ;;  %v541_v53 = vadd.f32 %v537_v2, %v533_v55  ;;  %v563_v21 = vadd.f32 %v559_v3, %v1959_v1 }
 0x12c   : > { %v1379_v6 = vpop.eup %1378  ;;  %v404_v13 = vadd.f32 1.0, %v1377_v59  ;;  %v569_v34 = vadd.f32 %v565_v5, %v561_v10  ;;  %1388 = vpow2.f32 %v496_v60  ;;  %v535_v24 = vadd.f32 %v531_v61, %v1947_v51 }
 0x12d   : > { %v1381_v12 = vpop.eup %1380  ;;  %v405_v17 = vadd.f32 1.0, %v1379_v6  ;;  %v2047_v22 = vmax.f32 %v540_v9, %v568_v15  ;;  %v576_v31 = vmin.f32 %v540_v9, %v568_v15  ;;  %v498_v32 = vmul.f32 1.442695, %v491_v7 }
 0x12e   : > { %v1383_v16 = vpop.eup %1382  ;;  %v406_v20 = vadd.f32 1.0, %v1381_v12  ;;  %v2050_v30 = vmax.f32 %v541_v53, %v569_v34  ;;  %1390 = vlog2.f32 %v404_v13  ;;  %v570_v33 = vadd.f32 %v566_v19, %v562_v14 }
 0x12f   : > { %v407_v23 = vadd.f32 1.0, %v1383_v16  ;;  %v577_v35 = vmin.f32 %v541_v53, %v569_v34  ;;  %1392 = vlog2.f32 %v405_v17  ;;  %v584_v41 = vsub.f32 %v576_v31, %v2047_v22 }
 0x130   : > { %1394 = vlog2.f32 %v406_v20  ;;  %v542_v43 = vadd.f32 %v538_v25, %v534_v8  ;;  %v571_v44 = vadd.f32 %v567_v29, %v563_v21  ;;  %v543_v46 = vadd.f32 %v539_v36, %v535_v24  ;;  %v660_v20 = vld [vmem:[#allocation8 + $0x60] sm:$0xff]  ;;  %v661_v25 = vld [vmem:[#allocation8 + $0x68] sm:$0xff] }
 0x131   : > { %v585_v45 = vsub.f32 %v577_v35, %v2050_v30  ;;  %1396 = vlog2.f32 %v407_v23  ;;  %v588_v54 = vmul.f32 1.442695, %v584_v41  ;;  %v614_v55 = vsub.s32 3, %v1935_v18  ;;  %v632_v35 = vld [vmem:[#allocation7 + $0x60] sm:$0xff] }
 0x132   : > { %1398 = vpow2.f32 %v498_v32  ;;  %v2054_v52 = vmax.f32 %v542_v43, %v570_v33  ;;  %v578_v47 = vmin.f32 %v542_v43, %v570_v33  ;;  %v2057_v57 = vmax.f32 %v543_v46, %v571_v44 }
 0x133   : > { %v579_v58 = vmin.f32 %v543_v46, %v571_v44  ;;  %v590_v59 = vmul.f32 1.442695, %v585_v45  ;;  %v643_v61 = vrot.slane %v1953_v62, %v614_v55  ;;  %v647_v4 = vrot.slane %v1955_v63, %v614_v55  ;;  %v633_v44 = vld [vmem:[#allocation7 + $0x68] sm:$0xff]  ;;  %v662_v45 = vld [vmem:[#allocation8 + $0x70] sm:$0xff] }
 0x134   : > { %v1385_v56 = vpop.eup %1384  ;;  %v586_v3 = vsub.f32 %v578_v47, %v2054_v52  ;;  %1400 = vpow2.f32 %v588_v54  ;;  %v615_v6 = vrot.slane %v1941_v48, %v614_v55  ;;  %v619_v7 = vrot.slane %v1943_v49, %v614_v55  ;;  %v634_v54 = vld [vmem:[#allocation7 + $0x70] sm:$0xff] }
 0x135   : > { %v1387_v60 = vpop.eup %1386  ;;  %v500_v5 = vadd.f32 1.0, %v1385_v56  ;;  %v587_v10 = vsub.f32 %v579_v58, %v2057_v57  ;;  %1402 = vpow2.f32 %v590_v59  ;;  %v651_v12 = vrot.slane %v1957_v0, %v614_v55 }
 0x136   : > { %v1389_v2 = vpop.eup %1388  ;;  %v501_v9 = vadd.f32 1.0, %v1387_v60  ;;  %v623_v15 = vrot.slane %v1945_v50, %v614_v55  ;;  %v656_v16 = vadd.f32 %v643_v61, %v1953_v62  ;;  %v592_v53 = vmul.f32 1.442695, %v586_v3 }
 0x137   : > { %v502_v14 = vadd.f32 1.0, %v1389_v2  ;;  %v655_v19 = vrot.slane %v1959_v1, %v614_v55  ;;  %v657_v34 = vadd.f32 %v647_v4, %v1955_v63  ;;  %1404 = vlog2.f32 %v500_v5  ;;  %v663_v2 = vld [vmem:[#allocation8 + $0x78] sm:$0xff] }
 0x138   : > { %v1391_v8 = vpop.eup %1390  ;;  %v627_v23 = vrot.slane %v1947_v51, %v614_v55  ;;  %v628_v24 = vadd.f32 %v615_v6, %v1941_v48  ;;  %v2073_v29 = vsub.s32 4, %v1935_v18  ;;  %1406 = vlog2.f32 %v501_v9 }
 0x139   : > { %v1393_v13 = vpop.eup %1392  ;;  %v594_v32 = vmul.f32 1.442695, %v587_v10  ;;  %v629_v33 = vadd.f32 %v619_v7, %v1943_v49  ;;  %v658_v36 = vadd.f32 %v651_v12, %v1957_v0  ;;  %v409_v41 = vmul.f32 0.6931472, %v1391_v8  ;;  %v635_v7 = vld [vmem:[#allocation7 + $0x78] sm:$0xff] }
 0x13a   : > { %v1395_v17 = vpop.eup %1394  ;;  %1408 = vlog2.f32 %v502_v14  ;;  %v630_v43 = vadd.f32 %v623_v15, %v1945_v50  ;;  %v664_v46 = vadd.f32 %v660_v20, %v656_v16  ;;  %v411_v47 = vmul.f32 0.6931472, %v1393_v13 }
 0x13b   : > { %v1397_v21 = vpop.eup %1396  ;;  %1410 = vpow2.f32 %v592_v53  ;;  %v659_v55 = vadd.f32 %v655_v19, %v1959_v1  ;;  %v665_v56 = vadd.f32 %v661_v25, %v657_v34  ;;  %v413_v58 = vmul.f32 0.6931472, %v1395_v17 }
 0x13c   : > { %v1399_v31 = vpop.eup %1398  ;;  %v415_v59 = vmul.f32 0.6931472, %v1397_v21  ;;  %v636_v61 = vadd.f32 %v632_v35, %v628_v24  ;;  %1412 = vpow2.f32 %v594_v32  ;;  %v631_v3 = vadd.f32 %v627_v23, %v1947_v51 }
 0x13d   : > { %v503_v60 = vadd.f32 1.0, %v1399_v31  ;;  %v637_v4 = vadd.f32 %v633_v44, %v629_v33  ;;  %v666_v5 = vadd.f32 %v662_v45, %v658_v36  ;;  %v638_v8 = vadd.f32 %v634_v54, %v630_v43 }
 0x13e   : > { %v1401_v6 = vpop.eup %1400  ;;  %v2080_v9 = vmax.f32 %v636_v61, %v664_v46  ;;  %v672_v10 = vmin.f32 %v636_v61, %v664_v46  ;;  %v2083_v12 = vsub.s32 5, %v1935_v18  ;;  %v416_v14 = vadd.f32 %v409_v41, %v1982_v37 }
 0x13f   : > { %v1403_v13 = vpop.eup %1402  ;;  %v667_v15 = vadd.f32 %v663_v2, %v659_v55  ;;  %v2086_v16 = vmax.f32 %v637_v4, %v665_v56  ;;  %v673_v17 = vmin.f32 %v637_v4, %v665_v56  ;;  %v417_v53 = vadd.f32 %v411_v47, %v1984_v38 }
 0x140   : > { %v418_v19 = vadd.f32 %v413_v58, %v1986_v39  ;;  %v419_v34 = vadd.f32 %v415_v59, %v1988_v40  ;;  %1414 = vlog2.f32 %v503_v60  ;;  %v596_v20 = vadd.f32 1.0, %v1401_v6  ;;  %v756_v6 = vld [vmem:[#allocation8 + $0x80] sm:$0xff] }
 0x141   : > { %v639_v21 = vadd.f32 %v635_v7, %v631_v3  ;;  %v2091_v23 = vmax.f32 %v638_v8, %v666_v5  ;;  %v674_v24 = vmin.f32 %v638_v8, %v666_v5  ;;  %v1405_v25 = vpop.eup %1404  ;;  %v597_v31 = vadd.f32 1.0, %v1403_v13 }
 0x142   : > { %v680_v37 = vsub.f32 %v672_v10, %v2080_v9  ;;  %v2095_v32 = vsub.s32 6, %v1935_v18  ;;  %v2098_v33 = vsub.s32 7, %v1935_v18  ;;  %v1407_v38 = vpop.eup %1406  ;;  %v484_v39 = vadd.f32 %v2014_v26, %v416_v14 }
 0x143   : > { %v2101_v40 = vmax.f32 %v639_v21, %v667_v15  ;;  %v675_v35 = vmin.f32 %v639_v21, %v667_v15  ;;  %v681_v36 = vsub.f32 %v673_v17, %v2086_v16  ;;  %v485_v43 = vadd.f32 %v2016_v27, %v417_v53 }
 0x144   : > { %v1409_v41 = vpop.eup %1408  ;;  %v486_v44 = vadd.f32 %v2018_v28, %v418_v19  ;;  %v487_v45 = vadd.f32 %v2025_v42, %v419_v34  ;;  %v711_v46 = vrot.slane %v1941_v48, %v2073_v29  ;;  %v505_v54 = vmul.f32 0.6931472, %v1405_v25  ;;  %v728_v19 = vld [vmem:[#allocation7 + $0x80] sm:$0xff]  ;;  %v757_v34 = vld [vmem:[#allocation8 + $0x88] sm:$0xff] }
 0x145   : > { %v1411_v47 = vpop.eup %1410  ;;  %1416 = vlog2.f32 %v596_v20  ;;  %v682_v26 = vsub.f32 %v674_v24, %v2091_v23  ;;  %v739_v55 = vrot.slane %v1953_v62, %v2073_v29  ;;  %v507_v56 = vmul.f32 0.6931472, %v1407_v38 }
 0x146   : > { %1418 = vlog2.f32 %v597_v31  ;;  %v684_v58 = vmul.f32 1.442695, %v680_v37  ;;  %v743_v27 = vrot.slane %v1955_v63, %v2073_v29  ;;  %v1413_v28 = vpop.eup %1412  ;;  %v683_v42 = vsub.f32 %v675_v35, %v2101_v40  ;;  %v729_v37 = vld [vmem:[#allocation7 + $0x88] sm:$0xff] }
 0x147   : > { %v686_v59 = vmul.f32 1.442695, %v681_v36  ;;  %v715_v60 = vrot.slane %v1943_v49, %v2073_v29  ;;  %v752_v61 = vadd.f32 %v739_v55, %v1953_v62  ;;  %v509_v2 = vmul.f32 0.6931472, %v1409_v41  ;;  %v758_v41 = vld [vmem:[#allocation8 + $0x90] sm:$0xff] }
 0x148   : > { %v512_v3 = vadd.f32 %v505_v54, %v484_v39  ;;  %v598_v4 = vadd.f32 1.0, %v1411_v47  ;;  %v747_v5 = vrot.slane %v1957_v0, %v2073_v29  ;;  %v688_v7 = vmul.f32 1.442695, %v682_v26  ;;  %v759_v54 = vld [vmem:[#allocation8 + $0x98] sm:$0xff]  ;;  %v730_v55 = vld [vmem:[#allocation7 + $0x90] sm:$0xff] }
 0x149   : > { %v724_v8 = vadd.f32 %v711_v46, %v1941_v48  ;;  %v751_v10 = vrot.slane %v1959_v1, %v2073_v29  ;;  %v753_v13 = vadd.f32 %v743_v27, %v1955_v63  ;;  %v599_v15 = vadd.f32 1.0, %v1413_v28 }
 0x14a   : > { %v1415_v14 = vpop.eup %1414  ;;  %1420 = vpow2.f32 %v684_v58  ;;  %v719_v17 = vrot.slane %v1945_v50, %v2073_v29  ;;  %v723_v53 = vrot.slane %v1947_v51, %v2073_v29  ;;  %v513_v20 = vadd.f32 %v507_v56, %v485_v43 }
 0x14b   : > { %1422 = vpow2.f32 %v686_v59  ;;  %v725_v21 = vadd.f32 %v715_v60, %v1943_v49  ;;  %v760_v24 = vadd.f32 %v756_v6, %v752_v61  ;;  %v514_v25 = vadd.f32 %v509_v2, %v486_v44 }
 0x14c   : > { %1424 = vlog2.f32 %v598_v4  ;;  %v690_v31 = vmul.f32 1.442695, %v683_v42  ;;  %v754_v38 = vadd.f32 %v747_v5, %v1957_v0  ;;  %v511_v39 = vmul.f32 0.6931472, %v1415_v14 }
 0x14d   : > { %v732_v35 = vadd.f32 %v728_v19, %v724_v8  ;;  %v755_v36 = vadd.f32 %v751_v10, %v1959_v1  ;;  %v761_v46 = vadd.f32 %v757_v34, %v753_v13  ;;  %v580_v29 = vadd.f32 %v2047_v22, %v512_v3  ;;  %v731_v22 = vld [vmem:[#allocation7 + $0x98] sm:$0xff] }
 0x14e   : > { %1426 = vlog2.f32 %v599_v15  ;;  %v726_v43 = vadd.f32 %v719_v17, %v1945_v50  ;;  %v727_v47 = vadd.f32 %v723_v53, %v1947_v51  ;;  %v515_v26 = vadd.f32 %v511_v39, %v487_v45 }
 0x14f   : > { %v1417_v44 = vpop.eup %1416  ;;  %v733_v56 = vadd.f32 %v729_v37, %v725_v21  ;;  %v2134_v58 = vmax.f32 %v732_v35, %v760_v24  ;;  %v768_v27 = vmin.f32 %v732_v35, %v760_v24  ;;  %v581_v42 = vadd.f32 %v2050_v30, %v513_v20  ;;  %v824_v37 = vld [vmem:[#allocation7 + $0xa0] sm:$0xff] }
 0x150   : > { %v1419_v28 = vpop.eup %1418  ;;  %v2138_v59 = vadd.f32 %v2054_v52, %v514_v25  ;;  %1428 = vpow2.f32 %v688_v7  ;;  %v762_v60 = vadd.f32 %v758_v41, %v754_v38  ;;  %v763_v61 = vadd.f32 %v759_v54, %v755_v36  ;;  %v825_v41 = vld [vmem:[#allocation7 + $0xa8] sm:$0xff] }
 0x151   : > { %1430 = vpow2.f32 %v690_v31  ;;  %v2140_v2 = vmax.f32 %v733_v56, %v761_v46  ;;  %v769_v3 = vmin.f32 %v733_v56, %v761_v46  ;;  %v601_v45 = vmul.f32 0.6931472, %v1417_v44 }
 0x152   : > { %v734_v4 = vadd.f32 %v730_v55, %v726_v43  ;;  %v807_v5 = vrot.slane %v1941_v48, %v2083_v12  ;;  %v811_v6 = vrot.slane %v1943_v49, %v2083_v12  ;;  %v2147_v30 = vadd.f32 %v2057_v57, %v515_v26  ;;  %v853_v43 = vld [vmem:[#allocation8 + $0xa8] sm:$0xff]  ;;  %v826_v26 = vld [vmem:[#allocation7 + $0xb0] sm:$0xff] }
 0x153   : > { %v735_v52 = vadd.f32 %v731_v22, %v727_v47  ;;  %v776_v7 = vsub.f32 %v768_v27, %v2134_v58  ;;  %v815_v8 = vrot.slane %v1945_v50, %v2083_v12  ;;  %v603_v13 = vmul.f32 0.6931472, %v1419_v28  ;;  %v854_v27 = vld [vmem:[#allocation8 + $0xb0] sm:$0xff] }
 0x154   : > { %v1421_v10 = vpop.eup %1420  ;;  %v608_v14 = vadd.f32 %v601_v45, %v580_v29  ;;  %v2152_v15 = vmax.f32 %v734_v4, %v762_v60  ;;  %v770_v17 = vmin.f32 %v734_v4, %v762_v60  ;;  %v777_v20 = vsub.f32 %v769_v3, %v2140_v2  ;;  %v852_v29 = vld [vmem:[#allocation8 + $0xa0] sm:$0xff] }
 0x155   : > { %v1423_v53 = vpop.eup %1422  ;;  %v2154_v19 = vmax.f32 %v735_v52, %v763_v61  ;;  %v771_v34 = vmin.f32 %v735_v52, %v763_v61  ;;  %v835_v57 = vrot.slane %v1953_v62, %v2083_v12  ;;  %v609_v24 = vadd.f32 %v603_v13, %v581_v42 }
 0x156   : > { %v1425_v21 = vpop.eup %1424  ;;  %v820_v25 = vadd.f32 %v807_v5, %v1941_v48  ;;  %v821_v31 = vadd.f32 %v811_v6, %v1943_v49  ;;  %v839_v38 = vrot.slane %v1955_v63, %v2083_v12  ;;  %v692_v39 = vadd.f32 1.0, %v1421_v10 }
 0x157   : > { %v780_v35 = vmul.f32 1.442695, %v776_v7  ;;  %v822_v36 = vadd.f32 %v815_v8, %v1945_v50  ;;  %v843_v46 = vrot.slane %v1957_v0, %v2083_v12  ;;  %v2167_v54 = vadd.f32 %v2080_v9, %v608_v14 }
 0x158   : > { %v1427_v47 = vpop.eup %1426  ;;  %v778_v44 = vsub.f32 %v770_v17, %v2152_v15  ;;  %v848_v55 = vadd.f32 %v835_v57, %v1953_v62  ;;  %v849_v56 = vadd.f32 %v839_v38, %v1955_v63  ;;  %v779_v28 = vsub.f32 %v771_v34, %v2154_v19 }
 0x159   : > { %v782_v42 = vmul.f32 1.442695, %v777_v20  ;;  %v847_v22 = vrot.slane %v1959_v1, %v2083_v12  ;;  %v850_v60 = vadd.f32 %v843_v46, %v1957_v0  ;;  %v828_v3 = vadd.f32 %v824_v37, %v820_v25  ;;  %v855_v25 = vld [vmem:[#allocation8 + $0xb8] sm:$0xff] }
 0x15a   : > { %v1429_v61 = vpop.eup %1428  ;;  %v829_v9 = vadd.f32 %v825_v41, %v821_v31  ;;  %v856_v45 = vadd.f32 %v852_v29, %v848_v55  ;;  %v857_v4 = vadd.f32 %v853_v43, %v849_v56  ;;  %1432 = vpow2.f32 %v780_v35 }
 0x15b   : > { %v1431_v5 = vpop.eup %1430  ;;  %v819_v6 = vrot.slane %v1947_v51, %v2083_v12  ;;  %v830_v52 = vadd.f32 %v826_v26, %v822_v36  ;;  %v858_v7 = vadd.f32 %v854_v27, %v850_v60  ;;  %v693_v8 = vadd.f32 1.0, %v1423_v53 }
 0x15c   : > { %v784_v10 = vmul.f32 1.442695, %v778_v44  ;;  %v2178_v13 = vmax.f32 %v828_v3, %v856_v45  ;;  %v2180_v14 = vmax.f32 %v829_v9, %v857_v4  ;;  %v605_v17 = vmul.f32 0.6931472, %v1425_v21  ;;  %v827_v21 = vld [vmem:[#allocation7 + $0xb8] sm:$0xff] }
 0x15d   : > { %1434 = vlog2.f32 %v692_v39  ;;  %v851_v34 = vadd.f32 %v847_v22, %v1959_v1  ;;  %v2183_v20 = vmax.f32 %v830_v52, %v858_v7  ;;  %v786_v57 = vmul.f32 1.442695, %v779_v28 }
 0x15e   : > { %v864_v31 = vmin.f32 %v828_v3, %v856_v45  ;;  %v865_v37 = vmin.f32 %v829_v9, %v857_v4  ;;  %v866_v38 = vmin.f32 %v830_v52, %v858_v7  ;;  %v607_v12 = vmul.f32 0.6931472, %v1427_v47  ;;  %v920_v45 = vld [vmem:[#allocation7 + $0xc0] sm:$0xff]  ;;  %v921_v52 = vld [vmem:[#allocation7 + $0xc8] sm:$0xff]  ;;  %v922_v7 = vld [vmem:[#allocation7 + $0xd0] sm:$0xff] }
 0x15f   : > { %v2186_v35 = vadd.f32 %v2086_v16, %v609_v24  ;;  %1436 = vpow2.f32 %v782_v42  ;;  %v823_v53 = vadd.f32 %v819_v6, %v1947_v51  ;;  %v694_v36 = vadd.f32 1.0, %v1429_v61 }
 0x160   : > { %1438 = vpow2.f32 %v784_v10  ;;  %v872_v39 = vsub.f32 %v864_v31, %v2178_v13  ;;  %v873_v41 = vsub.f32 %v865_v37, %v2180_v14  ;;  %v859_v46 = vadd.f32 %v855_v25, %v851_v34  ;;  %v949_v34 = vld [vmem:[#allocation8 + $0xc8] sm:$0xff]  ;;  %v950_v37 = vld [vmem:[#allocation8 + $0xd0] sm:$0xff] }
 0x161   : > { %1440 = vlog2.f32 %v693_v8  ;;  %v874_v29 = vsub.f32 %v866_v38, %v2183_v20  ;;  %v903_v43 = vrot.slane %v1941_v48, %v2095_v32  ;;  %v907_v24 = vrot.slane %v1943_v49, %v2095_v32  ;;  %v951_v38 = vld [vmem:[#allocation8 + $0xd8] sm:$0xff] }
 0x162   : > { %1442 = vpow2.f32 %v786_v57  ;;  %v876_v16 = vmul.f32 1.442695, %v872_v39  ;;  %v911_v47 = vrot.slane %v1945_v50, %v2095_v32  ;;  %v2199_v44 = vadd.f32 %v605_v17, %v2138_v59 }
 0x163   : > { %v2202_v26 = vadd.f32 %v607_v12, %v2147_v30  ;;  %v831_v55 = vadd.f32 %v827_v21, %v823_v53  ;;  %v878_v56 = vmul.f32 1.442695, %v873_v41  ;;  %v695_v27 = vadd.f32 1.0, %v1431_v5  ;;  %v948_v5 = vld [vmem:[#allocation8 + $0xc0] sm:$0xff]  ;;  %v923_v53 = vld [vmem:[#allocation7 + $0xd8] sm:$0xff] }
 0x164   : > { %1444 = vlog2.f32 %v694_v36  ;;  %v880_v28 = vmul.f32 1.442695, %v874_v29  ;;  %v915_v42 = vrot.slane %v1947_v51, %v2095_v32  ;;  %v1433_v22 = vpop.eup %1432  ;;  %v916_v3 = vadd.f32 %v903_v43, %v1941_v48 }
 0x165   : > { %v2206_v60 = vmax.f32 %v831_v55, %v859_v46  ;;  %v867_v61 = vmin.f32 %v831_v55, %v859_v46  ;;  %v931_v59 = vrot.slane %v1953_v62, %v2095_v32  ;;  %1446 = vpow2.f32 %v876_v16 }
 0x166   : > { %v917_v30 = vadd.f32 %v907_v24, %v1943_v49  ;;  %v918_v9 = vadd.f32 %v911_v47, %v1945_v50  ;;  %v935_v4 = vrot.slane %v1955_v63, %v2095_v32  ;;  %1448 = vpow2.f32 %v878_v56 }
 0x167   : > { %v1435_v6 = vpop.eup %1434  ;;  %v939_v8 = vrot.slane %v1957_v0, %v2095_v32  ;;  %v943_v10 = vrot.slane %v1959_v1, %v2095_v32  ;;  %v944_v17 = vadd.f32 %v931_v59, %v1953_v62  ;;  %v788_v57 = vadd.f32 1.0, %v1433_v22 }
 0x168   : > { %1450 = vpow2.f32 %v880_v28  ;;  %v919_v25 = vadd.f32 %v915_v42, %v1947_v51  ;;  %v945_v31 = vadd.f32 %v935_v4, %v1955_v63  ;;  %v924_v36 = vadd.f32 %v920_v45, %v916_v3 }
 0x169   : > { %v1437_v12 = vpop.eup %1436  ;;  %v946_v21 = vadd.f32 %v939_v8, %v1957_v0  ;;  %v947_v39 = vadd.f32 %v943_v10, %v1959_v1  ;;  %v952_v41 = vadd.f32 %v948_v5, %v944_v17  ;;  %v875_v46 = vsub.f32 %v867_v61, %v2206_v60 }
 0x16a   : > { %v1439_v32 = vpop.eup %1438  ;;  %v925_v29 = vadd.f32 %v921_v52, %v917_v30  ;;  %v926_v43 = vadd.f32 %v922_v7, %v918_v9  ;;  %v953_v16 = vadd.f32 %v949_v34, %v945_v31  ;;  %v789_v22 = vadd.f32 1.0, %v1437_v12 }
 0x16b   : > { %v1441_v24 = vpop.eup %1440  ;;  %v954_v47 = vadd.f32 %v950_v37, %v946_v21  ;;  %v955_v55 = vadd.f32 %v951_v38, %v947_v39  ;;  %v2225_v56 = vmax.f32 %v924_v36, %v952_v41  ;;  %v960_v28 = vmin.f32 %v924_v36, %v952_v41 }
 0x16c   : > { %v1443_v42 = vpop.eup %1442  ;;  %v927_v3 = vadd.f32 %v923_v53, %v919_v25  ;;  %v2227_v59 = vmax.f32 %v925_v29, %v953_v16  ;;  %v961_v45 = vmin.f32 %v925_v29, %v953_v16  ;;  %1452 = vlog2.f32 %v695_v27 }
 0x16d   : > { %v790_v4 = vadd.f32 1.0, %v1439_v32  ;;  %v2229_v5 = vmax.f32 %v926_v43, %v954_v47  ;;  %v962_v61 = vmin.f32 %v926_v43, %v954_v47  ;;  %v882_v9 = vmul.f32 1.442695, %v875_v46  ;;  %v1016_v47 = vld [vmem:[#allocation7 + $0xe0] sm:$0xff] }
 0x16e   : > { %v2231_v30 = vpop.eup %1444  ;;  %v2233_v52 = vmax.f32 %v927_v3, %v955_v55  ;;  %v963_v7 = vmin.f32 %v927_v3, %v955_v55  ;;  %v968_v8 = vsub.f32 %v960_v28, %v2225_v56  ;;  %v697_v10 = vmul.f32 0.6931472, %v1435_v6  ;;  %v1017_v28 = vld [vmem:[#allocation7 + $0xe8] sm:$0xff]  ;;  %v1018_v3 = vld [vmem:[#allocation7 + $0xf0] sm:$0xff] }
 0x16f   : > { %v791_v17 = vadd.f32 1.0, %v1443_v42  ;;  %1454 = vlog2.f32 %v788_v57  ;;  %v969_v34 = vsub.f32 %v961_v45, %v2227_v59  ;;  %v1447_v25 = vpop.eup %1446  ;;  %v999_v27 = vrot.slane %v1941_v48, %v2098_v33 }
 0x170   : > { %1456 = vlog2.f32 %v789_v22  ;;  %v1003_v31 = vrot.slane %v1943_v49, %v2098_v33  ;;  %v1007_v37 = vrot.slane %v1945_v50, %v2098_v33  ;;  %v1449_v38 = vpop.eup %1448  ;;  %v2245_v12 = vadd.f32 %v2091_v23, %v2199_v44  ;;  %v1044_v22 = vld [vmem:[#allocation8 + $0xe0] sm:$0xff] }
 0x171   : > { %v699_v6 = vmul.f32 0.6931472, %v1441_v24  ;;  %1458 = vlog2.f32 %v790_v4  ;;  %v970_v57 = vsub.f32 %v962_v61, %v2229_v5  ;;  %v2249_v36 = vadd.f32 %v697_v10, %v2167_v54  ;;  %v1045_v61 = vld [vmem:[#allocation8 + $0xe8] sm:$0xff] }
 0x172   : > { %v1451_v53 = vpop.eup %1450  ;;  %1460 = vpow2.f32 %v882_v9  ;;  %v971_v21 = vsub.f32 %v963_v7, %v2233_v52  ;;  %v972_v39 = vmul.f32 1.442695, %v968_v8  ;;  %v974_v32 = vmul.f32 1.442695, %v969_v34  ;;  %v1046_v9 = vld [vmem:[#allocation8 + $0xf0] sm:$0xff]  ;;  %v1019_v7 = vld [vmem:[#allocation7 + $0xf8] sm:$0xff] }
 0x173   : > { %v2253_v41 = vadd.f32 %v699_v6, %v2186_v35  ;;  %1462 = vlog2.f32 %v791_v17  ;;  %v1011_v23 = vrot.slane %v1947_v51, %v2098_v33  ;;  %v884_v44 = vadd.f32 1.0, %v1447_v25  ;;  %v1047_v34 = vld [vmem:[#allocation8 + $0xf8] sm:$0xff] }
 0x174   : > { %v1012_v46 = vadd.f32 %v999_v27, %v1941_v48  ;;  %v1013_v29 = vadd.f32 %v1003_v31, %v1943_v49  ;;  %v1014_v54 = vadd.f32 %v1007_v37, %v1945_v50  ;;  %v885_v43 = vadd.f32 1.0, %v1449_v38 }
 0x175   : > { %v886_v16 = vadd.f32 1.0, %v1451_v53  ;;  %v976_v24 = vmul.f32 1.442695, %v970_v57  ;;  %v1027_v35 = vrot.slane %v1953_v62, %v2098_v33  ;;  %1464 = vpow2.f32 %v972_v39 }
 0x176   : > { %v978_v55 = vmul.f32 1.442695, %v971_v21  ;;  %v1031_v42 = vrot.slane %v1955_v63, %v2098_v33  ;;  %v1035_v48 = vrot.slane %v1957_v0, %v2098_v33  ;;  %v1453_v49 = vpop.eup %1452  ;;  %1466 = vpow2.f32 %v974_v32 }
 0x177   : > { %v1015_v50 = vadd.f32 %v1011_v23, %v1947_v51  ;;  %v1039_v45 = vrot.slane %v1959_v1, %v2098_v33  ;;  %v1040_v4 = vadd.f32 %v1027_v35, %v1953_v62  ;;  %1468 = vlog2.f32 %v884_v44 }
 0x178   : > { %v1020_v8 = vadd.f32 %v1016_v47, %v1012_v46  ;;  %v1041_v10 = vadd.f32 %v1031_v42, %v1955_v63  ;;  %v1042_v17 = vadd.f32 %v1035_v48, %v1957_v0  ;;  %1470 = vpow2.f32 %v976_v24 }
 0x179   : > { %v1455_v25 = vpop.eup %1454  ;;  %v1021_v27 = vadd.f32 %v1017_v28, %v1013_v29  ;;  %v1043_v51 = vadd.f32 %v1039_v45, %v1959_v1  ;;  %v1048_v31 = vadd.f32 %v1044_v22, %v1040_v4  ;;  %1472 = vpow2.f32 %v978_v55 }
 0x17a   : > { %v1457_v37 = vpop.eup %1456  ;;  %v1022_v33 = vadd.f32 %v1018_v3, %v1014_v54  ;;  %v1049_v62 = vadd.f32 %v1045_v61, %v1041_v10  ;;  %v1050_v38 = vadd.f32 %v1046_v9, %v1042_v17  ;;  %v1023_v57 = vadd.f32 %v1019_v7, %v1015_v50 }
 0x17b   : > { %v1459_v6 = vpop.eup %1458  ;;  %v1051_v53 = vadd.f32 %v1047_v34, %v1043_v51  ;;  %v2273_v21 = vmax.f32 %v1020_v8, %v1048_v31  ;;  %v1056_v63 = vmin.f32 %v1020_v8, %v1048_v31  ;;  %1474 = vlog2.f32 %v885_v43 }
 0x17c   : > { %v1461_v39 = vpop.eup %1460  ;;  %v2275_v0 = vmax.f32 %v1021_v27, %v1049_v62  ;;  %v2277_v32 = vmax.f32 %v1022_v33, %v1050_v38  ;;  %v1057_v23 = vmin.f32 %v1021_v27, %v1049_v62  ;;  %v1058_v44 = vmin.f32 %v1022_v33, %v1050_v38 }
 0x17d   : > { %v1463_v1 = vpop.eup %1462  ;;  %v2279_v46 = vmax.f32 %v1023_v57, %v1051_v53  ;;  %v1059_v29 = vmin.f32 %v1023_v57, %v1051_v53  ;;  %v1064_v54 = vsub.f32 %v1056_v63, %v2273_v21  ;;  %v679_v24 = vadd.f32 %v2101_v40, %v2202_v26 }
 0x17e   : > { %v701_v47 = vmul.f32 0.6931472, %v2231_v30  ;;  %v772_v35 = vadd.f32 %v2134_v58, %v2249_v36  ;;  %v1065_v55 = vsub.f32 %v1057_v23, %v2275_v0  ;;  %v703_v28 = vmul.f32 0.6931472, %v1453_v49 }
 0x17f   : > { %v887_v42 = vadd.f32 1.0, %v1461_v39  ;;  %v1066_v48 = vsub.f32 %v1058_v44, %v2277_v32  ;;  %v1068_v43 = vmul.f32 1.442695, %v1064_v54  ;;  %v1465_v22 = vpop.eup %1464  ;;  %v773_v50 = vadd.f32 %v2140_v2, %v2253_v41 }
 0x180   : > { %1476 = vlog2.f32 %v886_v16  ;;  %v1067_v3 = vsub.f32 %v1059_v29, %v2279_v46  ;;  %v1070_v40 = vmul.f32 1.442695, %v1065_v55  ;;  %v1467_v26 = vpop.eup %1466  ;;  %v706_v30 = vadd.f32 %v701_v47, %v2245_v12 }
 0x181   : > { %v793_v45 = vmul.f32 0.6931472, %v1455_v25  ;;  %v980_v58 = vadd.f32 1.0, %v1465_v22  ;;  %1478 = vpow2.f32 %v1068_v43  ;;  %v1469_v36 = vpop.eup %1468  ;;  %v707_v49 = vadd.f32 %v703_v28, %v679_v24 }
 0x182   : > { %v795_v4 = vmul.f32 0.6931472, %v1457_v37  ;;  %v981_v61 = vadd.f32 1.0, %v1467_v26  ;;  %1480 = vpow2.f32 %v1070_v40  ;;  %v1471_v9 = vpop.eup %1470  ;;  %v1072_v8 = vmul.f32 1.442695, %v1066_v48 }
 0x183   : > { %v800_v7 = vadd.f32 %v793_v45, %v772_v35  ;;  %1482 = vlog2.f32 %v887_v42  ;;  %v1473_v2 = vpop.eup %1472  ;;  %v1074_v16 = vmul.f32 1.442695, %v1067_v3  ;;  %v774_v10 = vadd.f32 %v2152_v15, %v706_v30 }
 0x184   : > { %v801_v41 = vadd.f32 %v795_v4, %v773_v50  ;;  %1484 = vlog2.f32 %v980_v58  ;;  %v775_v12 = vadd.f32 %v2154_v19, %v707_v49  ;;  %v982_v17 = vadd.f32 1.0, %v1471_v9 }
 0x185   : > { %1486 = vlog2.f32 %v981_v61  ;;  %v1475_v34 = vpop.eup %1474  ;;  %v797_v25 = vmul.f32 0.6931472, %v1459_v6  ;;  %v868_v27 = vadd.f32 %v2178_v13, %v800_v7  ;;  %v983_v51 = vadd.f32 1.0, %v1473_v2 }
 0x186   : > { %1488 = vpow2.f32 %v1072_v8  ;;  %v799_v31 = vmul.f32 0.6931472, %v1463_v1  ;;  %v869_v37 = vadd.f32 %v2180_v14, %v801_v41  ;;  %v889_v62 = vmul.f32 0.6931472, %v1469_v36 }
 0x187   : > { %1490 = vpow2.f32 %v1074_v16  ;;  %v802_v33 = vadd.f32 %v797_v25, %v774_v10  ;;  %v891_v53 = vmul.f32 0.6931472, %v1475_v34 }
 0x188   : > { %v803_v57 = vadd.f32 %v799_v31, %v775_v12  ;;  %1492 = vlog2.f32 %v982_v17  ;;  %v896_v63 = vadd.f32 %v889_v62, %v868_v27 }
 0x189   : > { %1494 = vlog2.f32 %v983_v51  ;;  %v897_v39 = vadd.f32 %v891_v53, %v869_v37  ;;  %v870_v13 = vadd.f32 %v2183_v20, %v802_v33  ;;  %v1704_v53 = vmov 1966171168  }
 0x18a   : > { %v1477_v38 = vpop.eup %1476  ;;  %v871_v14 = vadd.f32 %v2206_v60, %v803_v57  ;;  %v964_v24 = vadd.f32 %v2225_v56, %v896_v63 }
 0x18b   : > { %v1479_v15 = vpop.eup %1478  ;;  %v893_v54 = vmul.f32 0.6931472, %v1477_v38  ;;  %v965_v35 = vadd.f32 %v2227_v59, %v897_v39 }
 0x18c   : > { %v1481_v19 = vpop.eup %1480  ;;  %v1076_v6 = vadd.f32 1.0, %v1479_v15 }
 0x18d   : > { %v1483_v23 = vpop.eup %1482  ;;  %v1077_v44 = vadd.f32 1.0, %v1481_v19  ;;  %v898_v28 = vadd.f32 %v893_v54, %v870_v13 }
 0x18e   : > { %v1485_v1 = vpop.eup %1484  ;;  %1496 = vlog2.f32 %v1076_v6  ;;  %v895_v47 = vmul.f32 0.6931472, %v1483_v23 }
 0x18f   : > { %v1487_v29 = vpop.eup %1486  ;;  %1498 = vlog2.f32 %v1077_v44  ;;  %v985_v42 = vmul.f32 0.6931472, %v1485_v1  ;;  %v966_v30 = vadd.f32 %v2229_v5, %v898_v28 }
 0x190   : > { %v1489_v55 = vpop.eup %1488  ;;  %v899_v43 = vadd.f32 %v895_v47, %v871_v14  ;;  %v987_v22 = vmul.f32 0.6931472, %v1487_v29 }
 0x191   : > { %v1491_v48 = vpop.eup %1490  ;;  %v1078_v20 = vadd.f32 1.0, %v1489_v55  ;;  %v992_v50 = vadd.f32 %v985_v42, %v964_v24 }
 0x192   : > { %v1079_v3 = vadd.f32 1.0, %v1491_v48  ;;  %v1493_v40 = vpop.eup %1492  ;;  %v993_v60 = vadd.f32 %v987_v22, %v965_v35  ;;  %v967_v56 = vadd.f32 %v2233_v52, %v899_v43 }
 0x193   : > { %1500 = vlog2.f32 %v1078_v20  ;;  %v1495_v26 = vpop.eup %1494  ;;  %v989_v45 = vmul.f32 0.6931472, %v1493_v40  ;;  %v1060_v59 = vadd.f32 %v2273_v21, %v992_v50 }
 0x194   : > { %1502 = vlog2.f32 %v1079_v3  ;;  %v991_v36 = vmul.f32 0.6931472, %v1495_v26  ;;  %v1061_v49 = vadd.f32 %v2275_v0, %v993_v60 }
 0x195   : > { %v994_v61 = vadd.f32 %v989_v45, %v966_v30 }
 0x196   : > { %v995_v7 = vadd.f32 %v991_v36, %v967_v56 }
 0x197   : > { %v1062_v16 = vadd.f32 %v2277_v32, %v994_v61  ;;  %v1123_v32 = vunpack.c.l.s4 %v1704_v53 }
 0x198   : > { %v1497_v58 = vpop.eup %1496  ;;  %v1063_v52 = vadd.f32 %v2279_v46, %v995_v7 }
 0x199   : > { %v1499_v4 = vpop.eup %1498  ;;  %v1081_v9 = vmul.f32 0.6931472, %v1497_v58  ;;  %v1124_v44 = vunpack.c.0.s8 %v1123_v32 }
 0x19a   : > { %v1083_v8 = vmul.f32 0.6931472, %v1499_v4 }
 0x19b   : > { %v1088_v2 = vadd.f32 %v1081_v9, %v1060_v59  ;;  %v1127_v47 = vsub.s32 %v1124_v44, %v1935_v18 }
 0x19c   : > { %v1089_v41 = vadd.f32 %v1083_v8, %v1061_v49 }
 0x19d   : > { %v1092_v5 = vrot.slane %v1088_v2, 4  ;;  %v1501_v10 = vpop.eup %1500 }
 0x19e   : > { %v1098_v12 = vrot.slane %v1089_v41, 4  ;;  %v1503_v17 = vpop.eup %1502  ;;  %v1085_v21 = vmul.f32 0.6931472, %v1501_v10 }
 0x19f   : > { %v1093_v34 = vadd.f32 %v1092_v5, %v1088_v2  ;;  %v1087_v25 = vmul.f32 0.6931472, %v1503_v17 }
 0x1a0   : > { %v1099_v27 = vadd.f32 %v1098_v12, %v1089_v41  ;;  %v1090_v0 = vadd.f32 %v1085_v21, %v1062_v16 }
 0x1a1   : > { %v1094_v51 = vrot.slane %v1093_v34, 2  ;;  %v1091_v31 = vadd.f32 %v1087_v25, %v1063_v52 }
 0x1a2   : > { %v1100_v37 = vrot.slane %v1099_v27, 2  ;;  %v1104_v62 = vrot.slane %v1090_v0, 4 }
 0x1a3   : > { %v1095_v33 = vadd.f32 %v1094_v51, %v1093_v34  ;;  %v1110_v57 = vrot.slane %v1091_v31, 4 }
 0x1a4   : > { %v1101_v38 = vadd.f32 %v1100_v37, %v1099_v27  ;;  %v1105_v63 = vadd.f32 %v1104_v62, %v1090_v0 }
 0x1a5   : > { %v1096_v15 = vrot.slane %v1095_v33, 1  ;;  %v1111_v19 = vadd.f32 %v1110_v57, %v1091_v31 }
 0x1a6   : > { %v1102_v46 = vrot.slane %v1101_v38, 1  ;;  %v1106_v39 = vrot.slane %v1105_v63, 2 }
 0x1a7   : > { %v1097_v6 = vadd.f32 %v1096_v15, %v1095_v33  ;;  %v1112_v13 = vrot.slane %v1111_v19, 2 }
 0x1a8   : > { %v1103_v23 = vadd.f32 %v1102_v46, %v1101_v38  ;;  %v1107_v1 = vadd.f32 %v1106_v39, %v1105_v63 }
 0x1a9   : > { %v1113_v14 = vadd.f32 %v1112_v13, %v1111_v19 }
 0x1aa   : > { %v1108_v29 = vrot.slane %v1107_v1, 1  ;;  %v1120_v24 = vcombine.low %v1097_v6, %v1103_v23 }
 0x1ab   : > { %v1114_v54 = vrot.slane %v1113_v14, 1 }
 0x1ac   : > { %v1109_v35 = vadd.f32 %v1108_v29, %v1107_v1  ;;  %v1128_v42 = vrot.slane %v1120_v24, %v1127_v47 }
 0x1ad   : > { %v1115_v55 = vadd.f32 %v1114_v54, %v1113_v14 }
 0x1af   : > { %v1121_v28 = vcombine.low %v1109_v35, %v1115_v55 }
 0x1b1   : > { %v1135_v48 = vrot.slane %v1121_v28, %v1127_v47 }
 0x1b3   : > { %v1136_v43 = vcombine.low %v1128_v42, %v1135_v48 }
 0x1b5   : > { %v1143_v22 = vrot.slane %v1136_v43, %v1127_v47 }
 0x1b7   : > { %1149 = vst.msk [vmem:[%s251_s14] sm:$0xf] %vm1147_vm0, %v1143_v22 }
 0x1b8   : > { %1631 = shalt.err (!%p1628_p13)
}
 0x1b9   : > { %s1632_s12 = scalar_lea.hbm %s2314_s28, 64  ;;  %s1636_s27 = scalar_lea.hbm %s2362_s4, 128 }
 0x1ba   : > { %p1633_p5 = scmp.ne.s32.totalorder %s2314_s28, %s1632_s12  ;;  %p1637_p11 = scmp.lt.u32.totalorder %s2314_s28, %s2362_s4 }
 0x1bb   : > { %p1638_p12 = scmp.lt.u32.totalorder %s1636_s27, %s1632_s12  ;;  %p1640_p1 = scmp.lt.u32.totalorder %s1632_s12, %s2314_s28 }
 0x1bc   : > { %p1634_p0 = pnand %p1633_p5, %p1873_p6 }
 0x1bd   : > { %p1639_p2 = por %p1638_p12, %p1637_p11 }
 0x1be   : > { %p1635_p9 = pneg %p1634_p0 }
 0x1bf   : > { %p1641_p4 = por %p1640_p1, %p1639_p2 }
 0x1c1   : > { %p1642_p8 = pnand %p1641_p4, %p1635_p9 }
 0x1c3   : > { %1645 = shalt.err (!%p1642_p8)
}
 0x1c4   : > { %1300 = dma.vmem_to_hbm [thread:$0]  (%p1873_p6), %s2316_s24, 64, %s2314_s28, %s1151_s7  }
 0x1c5 PF: > { %s1177_s21 = sand.u32 1, %s1680_s15   ;;  %p2380_p3 = scmp.ne.s32.totalorder %s2367_s22, 0 }
 0x1c6   : > { %p2381_p7 = scmp.ge.s32.totalorder %s1692_s18, 2  ;;  %s1178_s23 = scalar_lea.sflag [#allocation4], %s1177_s21 }
 0x1c8   : > { %p1317_p10 = pnand %p2381_p7, %p2380_p3 }
 0x1ca   : > { %1675 = dma.done.wait (!%p1317_p10), %s1178_s23, 64  }
 0x1cb   : > { %1677 = vsyncadd (!%p1317_p10), %s1178_s23, 4294967232  ;;  %p19_p13 = scmp.ge.s32.totalorder %s1859_s10, 4   ;;  %s2382_s15 = smov %s1684_s16 }
 0x1cc   : > { %s2383_s16 = smov %s1688_s17  ;;  %s2384_s17 = smov %s1869_s8 }
 0x1cd   : > { %s2385_s18 = smov %s1859_s10  ;;  %21 = sbr.rel (!%p19_p13) target bundleno = 7 (0x7), region = 93 }
 0x1d4   :  { %1183 = vsyncpa [#allocation3], 1 }
 0x1d5   :  { %1185 = vsyncpa [#allocation3 + $0x1], 1 }
 0x1d6   :  { %1186 = vsyncpa [#allocation6], 1 }
 0x1d7   :  { %1187 = vsyncpa [#allocation9], 1 }
 0x1d8   :  { %1188 = vsyncpa [#allocation4], 1 }
 0x1d9   :  { %1190 = vsyncpa [#allocation4 + $0x1], 1 }

</bundles_post_ra>
